<compile_context>
chip_gen: v7x
topology: tpu7x:2x2x1
jax: 0.10.0
libtpu: 0.0.40
codegen_flags: <defaults>
</compile_context>

<pallas_src>
import jax
import jax.numpy as jnp
from jax.experimental import pallas as pl
from jax.experimental.pallas import tpu as pltpu


def _ceil_to(x, m):
    return ((x + m - 1) // m) * m


def _pick_vmem_limit_bytes():
    # v5e/v6e: 128 MiB physical -> ~96 MiB scoped; v7x: 64 MiB -> ~48 MiB.
    try:
        cap = int(pltpu.get_tpu_info().vmem_capacity_bytes)
    except Exception:
        cap = 64 * 1024 * 1024          # conservative (v7x-sized) fallback
    return min(96 * 1024 * 1024, (cap * 3) // 4)


def _m2f2_head_kernel(
    vis_ref, df_ref,                               # grid-mapped activations
    txt_ref, itn_ref,                              # hoisted text feature, 1/||txt||
    wv_ref, bv_ref, gv_ref, bev_ref,               # vision_proj  (Linear + LayerNorm)
    wd_ref, bd_ref, gd_ref, bed_ref,               # deepfake_proj(Linear + LayerNorm)
    wos_ref, woc_ref, wod_ref, bo_ref,             # output Linear, split + alpha-folded
    out_ref,
):
    f32 = jnp.float32
    TB, P1p, Dvp = vis_ref.shape
    H = wv_ref.shape[1]
    hw = df_ref.shape[-1]

    # ---- vision projection + LayerNorm: one flattened bf16 matmul, f32 stats.
    #      (TB*P1p, Dvp) reshape is a layout no-op since P1p % 16 == 0.
    x = vis_ref[...].reshape(TB * P1p, Dvp)                           # bf16
    y = jnp.dot(x, wv_ref[...], preferred_element_type=f32) + bv_ref[...]
    mu = jnp.mean(y, axis=-1, keepdims=True)
    ms = jnp.mean(y * y, axis=-1, keepdims=True)
    var = jnp.maximum(ms - mu * mu, 0.0)
    vis_f = (y - mu) * jax.lax.rsqrt(var + 1e-5) * gv_ref[...] + bev_ref[...]
    # Single downcast; reused by the cosine block and the cls branch.
    # Padded-token rows have (y - mu) == 0 so the var=0 rsqrt is benign, and
    # they only ever hit zero rows of the output weight.
    vis_b = vis_f.astype(jnp.bfloat16).reshape(TB, P1p, H)            # no-op reshape

    cls = vis_b[:, 0, :]                                              # (TB, H) bf16

    # ---- cosine similarity vs. the hoisted, batch-invariant text feature ----
    # bf16 products, f32 accumulation (halves VALU traffic on v6e/v7x).
    # 1/max(||v||, eps) == rsqrt(max(||v||^2, eps^2)); 1/max(||t||, eps) is
    # precomputed in the wrapper, so the whole divide path is one rsqrt.
    txt_b = txt_ref[...]                                              # (1, H) bf16
    dot = jnp.sum(vis_b * txt_b[None, :, :], axis=-1, dtype=f32)      # (TB, P1p)
    psq = jnp.sum(vis_b * vis_b, axis=-1, dtype=f32)                  # (TB, P1p)
    scores = dot * jax.lax.rsqrt(jnp.maximum(psq, 1e-16)) * itn_ref[...]
    scores_b = scores.astype(jnp.bfloat16)

    # ---- deepfake branch: spatial mean (lane reduce) -> Linear -> LayerNorm -
    dsum = jnp.sum(df_ref[...], axis=-1, dtype=f32)                   # (TB, Cf)
    dfeat = (dsum * (1.0 / hw)).astype(jnp.bfloat16)
    yd = jnp.dot(dfeat, wd_ref[...], preferred_element_type=f32) + bd_ref[...]
    mud = jnp.mean(yd, axis=-1, keepdims=True)
    msd = jnp.mean(yd * yd, axis=-1, keepdims=True)
    vard = jnp.maximum(msd - mud * mud, 0.0)
    dproj = ((yd - mud) * jax.lax.rsqrt(vard + 1e-5) * gd_ref[...]
             + bed_ref[...]).astype(jnp.bfloat16)                     # (TB, H)

    # ---- output Linear on concat([scores, cls, deepfake]) as a split bf16
    #      matmul; clip_text/vision alphas are pre-folded into wos/woc and the
    #      output columns are padded to 128 so the store is lane-dense.
    out = (jnp.dot(scores_b, wos_ref[...], preferred_element_type=f32)
           + jnp.dot(cls, woc_ref[...], preferred_element_type=f32)
           + jnp.dot(dproj, wod_ref[...], preferred_element_type=f32)
           + bo_ref[...])
    out_ref[...] = out


def m2f2det_forward(clip_vision_features, clip_text_features,
                    deepfake_featmap_nchw, params, *, batch_tile=32):
    f32 = jnp.float32
    bf16 = jnp.bfloat16
    B, P1, Dv = clip_vision_features.shape
    _, Cf, hh, ww = deepfake_featmap_nchw.shape
    hw = hh * ww
    H = params["wv"].shape[1]
    NOUT = 128                      # lane-dense padded output width (true logits: cols 0..1)

    # ---- hoisted, batch-invariant text branch: Linear + LayerNorm + 1/norm --
    txt = clip_text_features.astype(f32) @ params["wt"] + params["bt"]
    mu = jnp.mean(txt, axis=-1, keepdims=True)
    var = jnp.mean(jnp.square(txt - mu), axis=-1, keepdims=True)
    txt = (txt - mu) * jax.lax.rsqrt(var + 1e-5) * params["gt"] + params["bet"]
    tnorm = jnp.sqrt(jnp.sum(txt * txt, axis=-1, keepdims=True))      # (1, 1)
    itn = 1.0 / jnp.maximum(tnorm, 1e-8)                              # (1, 1) f32
    txt_b = txt.astype(bf16)                                          # (1, H)

    # ---- fold the alpha scalars into the split, lane-dense output weights ---
    alpha_v = params["alphas"][0]
    alpha_t = params["alphas"][1]
    P1p = _ceil_to(P1, 16)          # bf16 sublane tile -> in-kernel reshapes are no-ops
    # Rows: 0 = cls token (excluded from scores), 1..P1-1 = patches, >=P1 = pad.
    wo_s_full = jnp.zeros((P1p, NOUT), f32).at[1:P1, :2].set(
        alpha_t * params["wo_s"].astype(f32)).astype(bf16)
    wo_c_full = jnp.zeros((H, NOUT), f32).at[:, :2].set(
        alpha_v * params["wo_c"].astype(f32)).astype(bf16)
    wo_d_full = jnp.zeros((H, NOUT), f32).at[:, :2].set(
        params["wo_d"].astype(f32)).astype(bf16)
    bo_full = jnp.zeros((1, NOUT), f32).at[:, :2].set(params["bo"])

    # ---- bf16 activations / projection weights (f32 accumulation in-kernel) -
    # Pad the CLIP width (contraction dim) to a multiple of 128 together with
    # the matching wv rows: exact, and keeps the big vis block lane-aligned.
    # H / Cf are 128-aligned for the real model (1024); at other sizes the
    # full-extent blocks below remain legal.
    Dvp = _ceil_to(Dv, 128)
    vis = jnp.pad(clip_vision_features,
                  ((0, 0), (0, P1p - P1), (0, Dvp - Dv))).astype(bf16)
    wv = jnp.pad(params["wv"], ((0, Dvp - Dv), (0, 0))).astype(bf16)
    wd = params["wd"].astype(bf16)
    # NCHW -> (B, Cf, h*w): a free reshape (no wrapper transpose); the spatial
    # mean becomes an in-kernel lane reduce and Cf stays on the contraction axis.
    df = deepfake_featmap_nchw.reshape(B, Cf, hw).astype(bf16)

    # ---- batch tiling: sublane-aligned tile, >=2 grid steps when possible ---
    TB = max(8, _ceil_to(min(batch_tile, _ceil_to(B, 8)), 8))
    Bp = _ceil_to(B, TB)
    if Bp // TB < 2:                # give v7x megacore two tiles to shard
        half = _ceil_to(TB // 2, 8)
        if 8 <= half < TB and Bp % half == 0:
            TB = half
    nb = Bp // TB

    vis = jnp.pad(vis, ((0, Bp - B), (0, 0), (0, 0)))
    df = jnp.pad(df, ((0, Bp - B), (0, 0), (0, 0)))

    # Batch-invariant weights: untiled, single VMEM copy (no double-buffering).
    wspec = pl.BlockSpec(memory_space=pltpu.MemorySpace.VMEM)
    in_specs = [
        pl.BlockSpec((TB, P1p, Dvp), lambda i: (i, 0, 0)),    # vision tokens
        pl.BlockSpec((TB, Cf, hw), lambda i: (i, 0, 0)),      # deepfake fmap
    ] + [wspec] * 14

    out = pl.pallas_call(
        _m2f2_head_kernel,
        out_shape=jax.ShapeDtypeStruct((Bp, NOUT), f32),
        grid=(nb,),
        in_specs=in_specs,
        out_specs=pl.BlockSpec((TB, NOUT), lambda i: (i, 0)),
        compiler_params=pltpu.CompilerParams(
            # batch tiles are independent -> megacore-shardable on v7x.
            dimension_semantics=("parallel",),
            vmem_limit_bytes=_pick_vmem_limit_bytes(),
        ),
    )(vis, df, txt_b, itn,
      wv, params["bv"], params["gv"], params["bev"],
      wd, params["bd"], params["gd"], params["bed"],
      wo_s_full, wo_c_full, wo_d_full, bo_full)
    return out[:B, :2]


def make_params(key, dv, dt, cf, hidden, num_patches):
    ks = jax.random.split(key, 8)
    f32 = jnp.float32

    def lin_w(k, din, dout, std=0.01):
        # matches nn.init.normal_(weight, std=0.01); stored as (in, out)
        return (std * jax.random.normal(k, (din, dout))).astype(f32)

    H = hidden
    params = {
        # vision_proj: Linear(Dv, H) + LayerNorm(H)
        "wv": lin_w(ks[0], dv, H), "bv": jnp.zeros((1, H), f32),
        "gv": jnp.ones((1, H), f32), "bev": jnp.zeros((1, H), f32),
        # text_proj: Linear(Dt, H) + LayerNorm(H)   (applied in the wrapper)
        "wt": lin_w(ks[1], dt, H), "bt": jnp.zeros((1, H), f32),
        "gt": jnp.ones((1, H), f32), "bet": jnp.zeros((1, H), f32),
        # deepfake_proj: Linear(Cf, H) + LayerNorm(H)
        "wd": lin_w(ks[2], cf, H), "bd": jnp.zeros((1, H), f32),
        "gd": jnp.ones((1, H), f32), "bed": jnp.zeros((1, H), f32),
        # clip_vision_alpha = 0.5, clip_text_alpha = 4.0
        "alphas": jnp.array([0.5, 4.0], f32),
    }
    # output: Linear(num_patches + 2*H, 2); split by input block so the kernel
    # avoids a lane-wise concat (mathematically identical).
    wo = lin_w(ks[3], num_patches + 2 * H, 2)
    params["wo_s"] = wo[:num_patches]                    # scores block (P, 2)
    params["wo_c"] = wo[num_patches:num_patches + H]     # cls block    (H, 2)
    params["wo_d"] = wo[num_patches + H:]                # deepfake blk (H, 2)
    params["bo"] = jnp.zeros((1, 2), f32)
    return params


if __name__ == "__main__":
    # Small, module-consistent shapes:
    #   B=2 images (2,3,16,16); CLIP vision tokens (B, 1+P, Dv) with P=8, Dv=32;
    #   CLIP text feature (1, Dt=32); DenseNet feature map (B, Cf=32, 4, 4);
    #   hidden_size=32  ->  output Linear(2*32+8, 2).
    B, C, Himg, Wimg = 2, 3, 16, 16
    P, Dv, Dt, Cf, hidden = 8, 32, 32, 32, 32

    root = jax.random.PRNGKey(0)
    k_img, k_vis, k_txt, k_df, k_par = jax.random.split(root, 5)

    # Encoders/backbone are external frozen models; only their outputs feed the head.
    images = jax.random.normal(k_img, (B, C, Himg, Wimg), jnp.float32)
    clip_vision_features = jax.random.normal(k_vis, (B, P + 1, Dv), jnp.float32)
    clip_text_features = jax.random.normal(k_txt, (1, Dt), jnp.float32)
    deepfake_featmap = jax.random.normal(k_df, (B, Cf, 4, 4), jnp.float32)  # NCHW backbone output

    params = make_params(k_par, Dv, Dt, Cf, hidden, P)

    out = m2f2det_forward(clip_vision_features, clip_text_features,
                          deepfake_featmap, params)
    out = jax.block_until_ready(out)
    assert out.shape == (B, 2) and out.dtype == jnp.float32
    assert bool(jnp.all(jnp.isfinite(out)))
    print("KERNEL_OK")
</pallas_src>

<mosaic_0001>
module attributes {stable_mosaic.version = 11 : i64} {
  func.func @_m2f2_head_kernel(%arg0: i32, %arg1: memref<8x16x128xbf16, #tpu.memory_space<vmem>>, %arg2: memref<8x32x16xbf16, #tpu.memory_space<vmem>>, %arg3: memref<1x32xbf16, #tpu.memory_space<vmem>>, %arg4: memref<1x1xf32, #tpu.memory_space<vmem>>, %arg5: memref<128x32xbf16, #tpu.memory_space<vmem>>, %arg6: memref<1x32xf32, #tpu.memory_space<vmem>>, %arg7: memref<1x32xf32, #tpu.memory_space<vmem>>, %arg8: memref<1x32xf32, #tpu.memory_space<vmem>>, %arg9: memref<32x32xbf16, #tpu.memory_space<vmem>>, %arg10: memref<1x32xf32, #tpu.memory_space<vmem>>, %arg11: memref<1x32xf32, #tpu.memory_space<vmem>>, %arg12: memref<1x32xf32, #tpu.memory_space<vmem>>, %arg13: memref<16x128xbf16, #tpu.memory_space<vmem>>, %arg14: memref<32x128xbf16, #tpu.memory_space<vmem>>, %arg15: memref<32x128xbf16, #tpu.memory_space<vmem>>, %arg16: memref<1x128xf32, #tpu.memory_space<vmem>>, %arg17: memref<8x128xf32, #tpu.memory_space<vmem>>) attributes {dimension_semantics = [#tpu.dimension_semantics<parallel>], iteration_bounds = array<i64: 1>, scalar_prefetch = 0 : i64, scratch_operands = 0 : i64, tpu.core_type = #tpu.core_type<tc>, window_params = [{transform_indices = @transform_0, window_bounds = array<i64: 8, 16, 128>}, {transform_indices = @transform_1, window_bounds = array<i64: 8, 32, 16>}, {pipeline_mode = #tpu.pipeline_mode<synchronous>, transform_indices = @transform_2, window_bounds = array<i64: 1, 32>}, {pipeline_mode = #tpu.pipeline_mode<synchronous>, transform_indices = @transform_3, window_bounds = array<i64: 1, 1>}, {pipeline_mode = #tpu.pipeline_mode<synchronous>, transform_indices = @transform_4, window_bounds = array<i64: 128, 32>}, {pipeline_mode = #tpu.pipeline_mode<synchronous>, transform_indices = @transform_5, window_bounds = array<i64: 1, 32>}, {pipeline_mode = #tpu.pipeline_mode<synchronous>, transform_indices = @transform_6, window_bounds = array<i64: 1, 32>}, {pipeline_mode = #tpu.pipeline_mode<synchronous>, transform_indices = @transform_7, window_bounds = array<i64: 1, 32>}, {pipeline_mode = #tpu.pipeline_mode<synchronous>, transform_indices = @transform_8, window_bounds = array<i64: 32, 32>}, {pipeline_mode = #tpu.pipeline_mode<synchronous>, transform_indices = @transform_9, window_bounds = array<i64: 1, 32>}, {pipeline_mode = #tpu.pipeline_mode<synchronous>, transform_indices = @transform_10, window_bounds = array<i64: 1, 32>}, {pipeline_mode = #tpu.pipeline_mode<synchronous>, transform_indices = @transform_11, window_bounds = array<i64: 1, 32>}, {pipeline_mode = #tpu.pipeline_mode<synchronous>, transform_indices = @transform_12, window_bounds = array<i64: 16, 128>}, {pipeline_mode = #tpu.pipeline_mode<synchronous>, transform_indices = @transform_13, window_bounds = array<i64: 32, 128>}, {pipeline_mode = #tpu.pipeline_mode<synchronous>, transform_indices = @transform_14, window_bounds = array<i64: 32, 128>}, {pipeline_mode = #tpu.pipeline_mode<synchronous>, transform_indices = @transform_15, window_bounds = array<i64: 1, 128>}, {transform_indices = @transform_16, window_bounds = array<i64: 8, 128>}]} {
    %c0 = arith.constant 0 : index
    %c0_0 = arith.constant 0 : index
    %c0_1 = arith.constant 0 : index
    %0 = vector.load %arg1[%c0, %c0_0, %c0_1] : memref<8x16x128xbf16, #tpu.memory_space<vmem>>, vector<8x16x128xbf16>
    %1 = vector.shape_cast %0 : vector<8x16x128xbf16> to vector<128x128xbf16>
    %c0_2 = arith.constant 0 : index
    %c0_3 = arith.constant 0 : index
    %2 = vector.load %arg5[%c0_2, %c0_3] : memref<128x32xbf16, #tpu.memory_space<vmem>>, vector<128x32xbf16>
    %cst = arith.constant dense<0.000000e+00> : vector<128x32xf32>
    %3 = tpu.matmul %1, %2, %cst {dimension_numbers = #tpu.dot_dimension_numbers<[1], [0], [0], [1], [0, 0, 1, 1], [], []>} : vector<128x128xbf16>, vector<128x32xbf16>, vector<128x32xf32> -> vector<128x32xf32>
    %c0_4 = arith.constant 0 : index
    %c0_5 = arith.constant 0 : index
    %4 = vector.load %arg6[%c0_4, %c0_5] : memref<1x32xf32, #tpu.memory_space<vmem>>, vector<1x32xf32>
    %5 = vector.broadcast %4 : vector<1x32xf32> to vector<128x32xf32>
    %6 = arith.addf %3, %5 : vector<128x32xf32>
    %cst_6 = arith.constant dense<0.000000e+00> : vector<128xf32>
    %7 = vector.multi_reduction <add>, %6, %cst_6 [1] : vector<128x32xf32> to vector<128xf32>
    %8 = vector.shape_cast %7 : vector<128xf32> to vector<128x1xf32>
    %cst_7 = arith.constant 3.200000e+01 : f32
    %9 = vector.broadcast %cst_7 : f32 to vector<128x1xf32>
    %10 = arith.divf %8, %9 : vector<128x1xf32>
    %11 = arith.mulf %6, %6 : vector<128x32xf32>
    %cst_8 = arith.constant dense<0.000000e+00> : vector<128xf32>
    %12 = vector.multi_reduction <add>, %11, %cst_8 [1] : vector<128x32xf32> to vector<128xf32>
    %13 = vector.shape_cast %12 : vector<128xf32> to vector<128x1xf32>
    %cst_9 = arith.constant 3.200000e+01 : f32
    %14 = vector.broadcast %cst_9 : f32 to vector<128x1xf32>
    %15 = arith.divf %13, %14 : vector<128x1xf32>
    %16 = arith.mulf %10, %10 : vector<128x1xf32>
    %17 = arith.subf %15, %16 : vector<128x1xf32>
    %cst_10 = arith.constant 0.000000e+00 : f32
    %18 = vector.broadcast %cst_10 : f32 to vector<128x1xf32>
    %19 = arith.maximumf %17, %18 : vector<128x1xf32>
    %20 = vector.broadcast %10 : vector<128x1xf32> to vector<128x32xf32>
    %21 = arith.subf %6, %20 : vector<128x32xf32>
    %cst_11 = arith.constant 9.99999974E-6 : f32
    %22 = vector.broadcast %cst_11 : f32 to vector<128x1xf32>
    %23 = arith.addf %19, %22 : vector<128x1xf32>
    %24 = math.rsqrt %23 : vector<128x1xf32>
    %25 = vector.broadcast %24 : vector<128x1xf32> to vector<128x32xf32>
    %26 = arith.mulf %21, %25 : vector<128x32xf32>
    %c0_12 = arith.constant 0 : index
    %c0_13 = arith.constant 0 : index
    %27 = vector.load %arg7[%c0_12, %c0_13] : memref<1x32xf32, #tpu.memory_space<vmem>>, vector<1x32xf32>
    %28 = vector.broadcast %27 : vector<1x32xf32> to vector<128x32xf32>
    %29 = arith.mulf %26, %28 : vector<128x32xf32>
    %c0_14 = arith.constant 0 : index
    %c0_15 = arith.constant 0 : index
    %30 = vector.load %arg8[%c0_14, %c0_15] : memref<1x32xf32, #tpu.memory_space<vmem>>, vector<1x32xf32>
    %31 = vector.broadcast %30 : vector<1x32xf32> to vector<128x32xf32>
    %32 = arith.addf %29, %31 : vector<128x32xf32>
    %33 = arith.truncf %32 : vector<128x32xf32> to vector<128x32xbf16>
    %34 = vector.shape_cast %33 : vector<128x32xbf16> to vector<8x16x32xbf16>
    %35 = vector.extract_strided_slice %34 {offsets = [0, 0, 0], sizes = [8, 1, 32], strides = [1, 1, 1]} : vector<8x16x32xbf16> to vector<8x1x32xbf16>
    %36 = vector.shape_cast %35 : vector<8x1x32xbf16> to vector<8x32xbf16>
    %c0_16 = arith.constant 0 : index
    %c0_17 = arith.constant 0 : index
    %37 = vector.load %arg3[%c0_16, %c0_17] : memref<1x32xbf16, #tpu.memory_space<vmem>>, vector<1x32xbf16>
    %38 = vector.shape_cast %37 : vector<1x32xbf16> to vector<1x1x32xbf16>
    %39 = vector.broadcast %38 : vector<1x1x32xbf16> to vector<8x16x32xbf16>
    %40 = arith.mulf %34, %39 : vector<8x16x32xbf16>
    %41 = arith.extf %40 : vector<8x16x32xbf16> to vector<8x16x32xf32>
    %cst_18 = arith.constant dense<0.000000e+00> : vector<8x16xf32>
    %42 = vector.multi_reduction <add>, %41, %cst_18 [2] : vector<8x16x32xf32> to vector<8x16xf32>
    %43 = arith.mulf %34, %34 : vector<8x16x32xbf16>
    %44 = arith.extf %43 : vector<8x16x32xbf16> to vector<8x16x32xf32>
    %cst_19 = arith.constant dense<0.000000e+00> : vector<8x16xf32>
    %45 = vector.multi_reduction <add>, %44, %cst_19 [2] : vector<8x16x32xf32> to vector<8x16xf32>
    %cst_20 = arith.constant 1.000000e-16 : f32
    %46 = vector.broadcast %cst_20 : f32 to vector<8x16xf32>
    %47 = arith.maximumf %45, %46 : vector<8x16xf32>
    %48 = math.rsqrt %47 : vector<8x16xf32>
    %49 = arith.mulf %42, %48 : vector<8x16xf32>
    %c0_21 = arith.constant 0 : index
    %c0_22 = arith.constant 0 : index
    %50 = vector.load %arg4[%c0_21, %c0_22] : memref<1x1xf32, #tpu.memory_space<vmem>>, vector<1x1xf32>
    %51 = vector.broadcast %50 : vector<1x1xf32> to vector<8x16xf32>
    %52 = arith.mulf %49, %51 : vector<8x16xf32>
    %53 = arith.truncf %52 : vector<8x16xf32> to vector<8x16xbf16>
    %c0_23 = arith.constant 0 : index
    %c0_24 = arith.constant 0 : index
    %c0_25 = arith.constant 0 : index
    %54 = vector.load %arg2[%c0_23, %c0_24, %c0_25] : memref<8x32x16xbf16, #tpu.memory_space<vmem>>, vector<8x32x16xbf16>
    %55 = arith.extf %54 : vector<8x32x16xbf16> to vector<8x32x16xf32>
    %cst_26 = arith.constant dense<0.000000e+00> : vector<8x32xf32>
    %56 = vector.multi_reduction <add>, %55, %cst_26 [2] : vector<8x32x16xf32> to vector<8x32xf32>
    %cst_27 = arith.constant 6.250000e-02 : f32
    %57 = vector.broadcast %cst_27 : f32 to vector<8x32xf32>
    %58 = arith.mulf %56, %57 : vector<8x32xf32>
    %59 = arith.truncf %58 : vector<8x32xf32> to vector<8x32xbf16>
    %c0_28 = arith.constant 0 : index
    %c0_29 = arith.constant 0 : index
    %60 = vector.load %arg9[%c0_28, %c0_29] : memref<32x32xbf16, #tpu.memory_space<vmem>>, vector<32x32xbf16>
    %cst_30 = arith.constant dense<0.000000e+00> : vector<8x32xf32>
    %61 = tpu.matmul %59, %60, %cst_30 {dimension_numbers = #tpu.dot_dimension_numbers<[1], [0], [0], [1], [0, 0, 1, 1], [], []>} : vector<8x32xbf16>, vector<32x32xbf16>, vector<8x32xf32> -> vector<8x32xf32>
    %c0_31 = arith.constant 0 : index
    %c0_32 = arith.constant 0 : index
    %62 = vector.load %arg10[%c0_31, %c0_32] : memref<1x32xf32, #tpu.memory_space<vmem>>, vector<1x32xf32>
    %63 = vector.broadcast %62 : vector<1x32xf32> to vector<8x32xf32>
    %64 = arith.addf %61, %63 : vector<8x32xf32>
    %cst_33 = arith.constant dense<0.000000e+00> : vector<8xf32>
    %65 = vector.multi_reduction <add>, %64, %cst_33 [1] : vector<8x32xf32> to vector<8xf32>
    %66 = vector.shape_cast %65 : vector<8xf32> to vector<8x1xf32>
    %cst_34 = arith.constant 3.200000e+01 : f32
    %67 = vector.broadcast %cst_34 : f32 to vector<8x1xf32>
    %68 = arith.divf %66, %67 : vector<8x1xf32>
    %69 = arith.mulf %64, %64 : vector<8x32xf32>
    %cst_35 = arith.constant dense<0.000000e+00> : vector<8xf32>
    %70 = vector.multi_reduction <add>, %69, %cst_35 [1] : vector<8x32xf32> to vector<8xf32>
    %71 = vector.shape_cast %70 : vector<8xf32> to vector<8x1xf32>
    %cst_36 = arith.constant 3.200000e+01 : f32
    %72 = vector.broadcast %cst_36 : f32 to vector<8x1xf32>
    %73 = arith.divf %71, %72 : vector<8x1xf32>
    %74 = arith.mulf %68, %68 : vector<8x1xf32>
    %75 = arith.subf %73, %74 : vector<8x1xf32>
    %cst_37 = arith.constant 0.000000e+00 : f32
    %76 = vector.broadcast %cst_37 : f32 to vector<8x1xf32>
    %77 = arith.maximumf %75, %76 : vector<8x1xf32>
    %78 = vector.broadcast %68 : vector<8x1xf32> to vector<8x32xf32>
    %79 = arith.subf %64, %78 : vector<8x32xf32>
    %cst_38 = arith.constant 9.99999974E-6 : f32
    %80 = vector.broadcast %cst_38 : f32 to vector<8x1xf32>
    %81 = arith.addf %77, %80 : vector<8x1xf32>
    %82 = math.rsqrt %81 : vector<8x1xf32>
    %83 = vector.broadcast %82 : vector<8x1xf32> to vector<8x32xf32>
    %84 = arith.mulf %79, %83 : vector<8x32xf32>
    %c0_39 = arith.constant 0 : index
    %c0_40 = arith.constant 0 : index
    %85 = vector.load %arg11[%c0_39, %c0_40] : memref<1x32xf32, #tpu.memory_space<vmem>>, vector<1x32xf32>
    %86 = vector.broadcast %85 : vector<1x32xf32> to vector<8x32xf32>
    %87 = arith.mulf %84, %86 : vector<8x32xf32>
    %c0_41 = arith.constant 0 : index
    %c0_42 = arith.constant 0 : index
    %88 = vector.load %arg12[%c0_41, %c0_42] : memref<1x32xf32, #tpu.memory_space<vmem>>, vector<1x32xf32>
    %89 = vector.broadcast %88 : vector<1x32xf32> to vector<8x32xf32>
    %90 = arith.addf %87, %89 : vector<8x32xf32>
    %91 = arith.truncf %90 : vector<8x32xf32> to vector<8x32xbf16>
    %c0_43 = arith.constant 0 : index
    %c0_44 = arith.constant 0 : index
    %92 = vector.load %arg13[%c0_43, %c0_44] : memref<16x128xbf16, #tpu.memory_space<vmem>>, vector<16x128xbf16>
    %cst_45 = arith.constant dense<0.000000e+00> : vector<8x128xf32>
    %93 = tpu.matmul %53, %92, %cst_45 {dimension_numbers = #tpu.dot_dimension_numbers<[1], [0], [0], [1], [0, 0, 1, 1], [], []>} : vector<8x16xbf16>, vector<16x128xbf16>, vector<8x128xf32> -> vector<8x128xf32>
    %c0_46 = arith.constant 0 : index
    %c0_47 = arith.constant 0 : index
    %94 = vector.load %arg14[%c0_46, %c0_47] : memref<32x128xbf16, #tpu.memory_space<vmem>>, vector<32x128xbf16>
    %cst_48 = arith.constant dense<0.000000e+00> : vector<8x128xf32>
    %95 = tpu.matmul %36, %94, %cst_48 {dimension_numbers = #tpu.dot_dimension_numbers<[1], [0], [0], [1], [0, 0, 1, 1], [], []>} : vector<8x32xbf16>, vector<32x128xbf16>, vector<8x128xf32> -> vector<8x128xf32>
    %96 = arith.addf %93, %95 : vector<8x128xf32>
    %c0_49 = arith.constant 0 : index
    %c0_50 = arith.constant 0 : index
    %97 = vector.load %arg15[%c0_49, %c0_50] : memref<32x128xbf16, #tpu.memory_space<vmem>>, vector<32x128xbf16>
    %cst_51 = arith.constant dense<0.000000e+00> : vector<8x128xf32>
    %98 = tpu.matmul %91, %97, %cst_51 {dimension_numbers = #tpu.dot_dimension_numbers<[1], [0], [0], [1], [0, 0, 1, 1], [], []>} : vector<8x32xbf16>, vector<32x128xbf16>, vector<8x128xf32> -> vector<8x128xf32>
    %99 = arith.addf %96, %98 : vector<8x128xf32>
    %c0_52 = arith.constant 0 : index
    %c0_53 = arith.constant 0 : index
    %100 = vector.load %arg16[%c0_52, %c0_53] : memref<1x128xf32, #tpu.memory_space<vmem>>, vector<1x128xf32>
    %101 = vector.broadcast %100 : vector<1x128xf32> to vector<8x128xf32>
    %102 = arith.addf %99, %101 : vector<8x128xf32>
    %c0_54 = arith.constant 0 : index
    %c0_55 = arith.constant 0 : index
    %103 = vector.load %arg17[%c0_54, %c0_55] : memref<8x128xf32, #tpu.memory_space<vmem>>, vector<8x128xf32>
    tpu.vector_store %arg17[%c0_54, %c0_55], %102 {strides = array<i32>} : memref<8x128xf32, #tpu.memory_space<vmem>>, vector<8x128xf32>,
    return
  }
  func.func @transform_0(%arg0: i32) -> (i32, i32, i32) {
    %c0_i32 = arith.constant 0 : i32
    %c0_i32_0 = arith.constant 0 : i32
    %c0_i32_1 = arith.constant 0 : i32
    return %arg0, %c0_i32, %c0_i32_0 : i32, i32, i32
  }
  func.func @transform_1(%arg0: i32) -> (i32, i32, i32) {
    %c0_i32 = arith.constant 0 : i32
    %c0_i32_0 = arith.constant 0 : i32
    %c0_i32_1 = arith.constant 0 : i32
    return %arg0, %c0_i32, %c0_i32_0 : i32, i32, i32
  }
  func.func @transform_2(%arg0: i32) -> (i32, i32) {
    %c0_i32 = arith.constant 0 : i32
    %c0_i32_0 = arith.constant 0 : i32
    %c0_i32_1 = arith.constant 0 : i32
    return %c0_i32, %c0_i32_0 : i32, i32
  }
  func.func @transform_3(%arg0: i32) -> (i32, i32) {
    %c0_i32 = arith.constant 0 : i32
    %c0_i32_0 = arith.constant 0 : i32
    %c0_i32_1 = arith.constant 0 : i32
    return %c0_i32, %c0_i32_0 : i32, i32
  }
  func.func @transform_4(%arg0: i32) -> (i32, i32) {
    %c0_i32 = arith.constant 0 : i32
    %c0_i32_0 = arith.constant 0 : i32
    %c0_i32_1 = arith.constant 0 : i32
    return %c0_i32, %c0_i32_0 : i32, i32
  }
  func.func @transform_5(%arg0: i32) -> (i32, i32) {
    %c0_i32 = arith.constant 0 : i32
    %c0_i32_0 = arith.constant 0 : i32
    %c0_i32_1 = arith.constant 0 : i32
    return %c0_i32, %c0_i32_0 : i32, i32
  }
  func.func @transform_6(%arg0: i32) -> (i32, i32) {
    %c0_i32 = arith.constant 0 : i32
    %c0_i32_0 = arith.constant 0 : i32
    %c0_i32_1 = arith.constant 0 : i32
    return %c0_i32, %c0_i32_0 : i32, i32
  }
  func.func @transform_7(%arg0: i32) -> (i32, i32) {
    %c0_i32 = arith.constant 0 : i32
    %c0_i32_0 = arith.constant 0 : i32
    %c0_i32_1 = arith.constant 0 : i32
    return %c0_i32, %c0_i32_0 : i32, i32
  }
  func.func @transform_8(%arg0: i32) -> (i32, i32) {
    %c0_i32 = arith.constant 0 : i32
    %c0_i32_0 = arith.constant 0 : i32
    %c0_i32_1 = arith.constant 0 : i32
    return %c0_i32, %c0_i32_0 : i32, i32
  }
  func.func @transform_9(%arg0: i32) -> (i32, i32) {
    %c0_i32 = arith.constant 0 : i32
    %c0_i32_0 = arith.constant 0 : i32
    %c0_i32_1 = arith.constant 0 : i32
    return %c0_i32, %c0_i32_0 : i32, i32
  }
  func.func @transform_10(%arg0: i32) -> (i32, i32) {
    %c0_i32 = arith.constant 0 : i32
    %c0_i32_0 = arith.constant 0 : i32
    %c0_i32_1 = arith.constant 0 : i32
    return %c0_i32, %c0_i32_0 : i32, i32
  }
  func.func @transform_11(%arg0: i32) -> (i32, i32) {
    %c0_i32 = arith.constant 0 : i32
    %c0_i32_0 = arith.constant 0 : i32
    %c0_i32_1 = arith.constant 0 : i32
    return %c0_i32, %c0_i32_0 : i32, i32
  }
  func.func @transform_12(%arg0: i32) -> (i32, i32) {
    %c0_i32 = arith.constant 0 : i32
    %c0_i32_0 = arith.constant 0 : i32
    %c0_i32_1 = arith.constant 0 : i32
    return %c0_i32, %c0_i32_0 : i32, i32
  }
  func.func @transform_13(%arg0: i32) -> (i32, i32) {
    %c0_i32 = arith.constant 0 : i32
    %c0_i32_0 = arith.constant 0 : i32
    %c0_i32_1 = arith.constant 0 : i32
    return %c0_i32, %c0_i32_0 : i32, i32
  }
  func.func @transform_14(%arg0: i32) -> (i32, i32) {
    %c0_i32 = arith.constant 0 : i32
    %c0_i32_0 = arith.constant 0 : i32
    %c0_i32_1 = arith.constant 0 : i32
    return %c0_i32, %c0_i32_0 : i32, i32
  }
  func.func @transform_15(%arg0: i32) -> (i32, i32) {
    %c0_i32 = arith.constant 0 : i32
    %c0_i32_0 = arith.constant 0 : i32
    %c0_i32_1 = arith.constant 0 : i32
    return %c0_i32, %c0_i32_0 : i32, i32
  }
  func.func @transform_16(%arg0: i32) -> (i32, i32) {
    %c0_i32 = arith.constant 0 : i32
    %c0_i32_0 = arith.constant 0 : i32
    return %arg0, %c0_i32 : i32, i32
  }
}

</mosaic_0001>

<bundles_post_ra>
// kernel: tpu_custom_call.1
= control target key start
LH: loop header
LB: loop body
LE: loop exit
PB: predicated region body
PF: predicated region fallthrough
CT: control target
= control target key end

     0   :  { %s2823_s0 = inlined_call_operand.vmem [shape: bf16[8,16,128], index: 0, kind: input, shape index: {}]   ;;  %s2824_s1 = inlined_call_operand.vmem [shape: bf16[8,32,16], index: 1, kind: input, shape index: {}]   ;;  %s2825_s2 = inlined_call_operand.vmem [shape: bf16[1,32], index: 2, kind: input, shape index: {}]   ;;  %s2826_s3 = inlined_call_operand.<no memory space> [shape: f32[1,1], index: 3, kind: input, shape index: {}]   ;;  %s2827_s4 = inlined_call_operand.vmem [shape: bf16[128,32], index: 4, kind: input, shape index: {}]   ;;  %s2828_s5 = inlined_call_operand.vmem [shape: f32[1,32], index: 5, kind: input, shape index: {}]   ;;  %s2829_s6 = inlined_call_operand.vmem [shape: f32[1,32], index: 6, kind: input, shape index: {}]   ;;  %s2830_s7 = inlined_call_operand.vmem [shape: f32[1,32], index: 7, kind: input, shape index: {}]   ;;  %s2831_s8 = inlined_call_operand.vmem [shape: bf16[32,32], index: 8, kind: input, shape index: {}]   ;;  %s2832_s9 = inlined_call_operand.vmem [shape: f32[1,32], index: 9, kind: input, shape index: {}]   ;;  %s2833_s10 = inlined_call_operand.vmem [shape: f32[1,32], index: 10, kind: input, shape index: {}]   ;;  %s2834_s11 = inlined_call_operand.vmem [shape: f32[1,32], index: 11, kind: input, shape index: {}]   ;;  %s2835_s12 = inlined_call_operand.vmem [shape: bf16[16,128], index: 12, kind: input, shape index: {}]   ;;  %s2836_s13 = inlined_call_operand.vmem [shape: bf16[32,128], index: 13, kind: input, shape index: {}]   ;;  %s2837_s14 = inlined_call_operand.vmem [shape: bf16[32,128], index: 14, kind: input, shape index: {}]   ;;  %s2838_s15 = inlined_call_operand.vmem [shape: f32[1,128], index: 15, kind: input, shape index: {}]   ;;  %s2839_s16 = inlined_call_operand.hbm [shape: f32[8,128], index: 16, kind: output, shape index: {}]  }
   0x1   :  { %2841 = sst [smem:[#allocation6_spill]] %s2823_s0  ;;  %v21_v0 = vstv %s2826_s3 }
   0x2   :  { %22 = vst [vmem:[#allocation2] sm:$0x1] %v21_v0 }
   0x3   :  { %v1902_v1 = vld [vmem:[%s2827_s4] sm:$0xff]   ;;  %v1794_v2 = vld [vmem:[%s2824_s1 + $0x10] sm:$0xff]   ;;  %vm899_vm0 = vcmask 130048   ;;  %v1903_v6 = vld [vmem:[%s2827_s4 + $0x8] sm:$0xff]   ;;  %s2842_s29 = sld [smem:[#allocation6_spill]] }
   0x4   :  { %v1730_v3 = vld [vmem:[%s2824_s1] sm:$0xff]   ;;  %1835 = vmatprep.subr.bf16.mxu0 %v1902_v1  ;;  %v1739_v4 = vunpack.c.l.bf16 %v1794_v2  ;;  %v1740_v7 = vunpack.c.h.bf16 %v1794_v2  ;;  %v1793_v9 = vld [vmem:[%s2824_s1 + $0x8] sm:$0xff]   ;;  %v1904_v12 = vld [vmem:[%s2827_s4 + $0x10] sm:$0xff]  }
   0x5   :  { %v1731_v5 = vunpack.c.l.bf16 %v1730_v3  ;;  %v1732_v8 = vunpack.c.h.bf16 %v1730_v3  ;;  %1836 = vmatpush3.bf16.msra.mxu0 %v1902_v1  ;;  %v1736_v15 = vunpack.c.h.bf16 %v1793_v9  ;;  %v1735_v16 = vunpack.c.l.bf16 %v1793_v9  ;;  %v1795_v17 = vld [vmem:[%s2824_s1 + $0x18] sm:$0xff]   ;;  %v1796_v23 = vld [vmem:[%s2824_s1 + $0x20] sm:$0xff]   ;;  %v1797_v30 = vld [vmem:[%s2824_s1 + $0x28] sm:$0xff]  }
   0x6   :  { %v912_v10 = vsel %vm899_vm0, %v1739_v4, 0.0  ;;  %1837 = vmatprep.subr.bf16.mxu0 %v1903_v6  ;;  %v915_v13 = vsel %vm899_vm0, %v1740_v7, 0.0  ;;  %v1905_v18 = vld [vmem:[%s2827_s4 + $0x18] sm:$0xff]   ;;  %v1744_v21 = vunpack.c.h.bf16 %v1795_v17  ;;  %v1743_v22 = vunpack.c.l.bf16 %v1795_v17  ;;  %v1906_v24 = vld [vmem:[%s2827_s4 + $0x20] sm:$0xff]   ;;  %v1907_v31 = vld [vmem:[%s2827_s4 + $0x28] sm:$0xff]  }
   0x7   :  { %v900_v11 = vsel %vm899_vm0, %v1731_v5, 0.0  ;;  %913 = vadd.xlane.f32.xlu1 %v912_v10  ;;  %v903_v14 = vsel %vm899_vm0, %v1732_v8, 0.0  ;;  %v909_v19 = vsel %vm899_vm0, %v1736_v15, 0.0  ;;  %v906_v20 = vsel %vm899_vm0, %v1735_v16, 0.0  ;;  %v1798_v32 = vld [vmem:[%s2824_s1 + $0x30] sm:$0xff]   ;;  %v1799_v42 = vld [vmem:[%s2824_s1 + $0x38] sm:$0xff]  }
   0x8   :  { %901 = vadd.xlane.f32.xlu0 %v900_v11  ;;  %v921_v26 = vsel %vm899_vm0, %v1744_v21, 0.0  ;;  %v918_v27 = vsel %vm899_vm0, %v1743_v22, 0.0  ;;  %v1748_v28 = vunpack.c.h.bf16 %v1796_v23  ;;  %v1747_v29 = vunpack.c.l.bf16 %v1796_v23  ;;  %v1908_v37 = vld [vmem:[%s2827_s4 + $0x30] sm:$0xff]   ;;  %v1909_v44 = vld [vmem:[%s2827_s4 + $0x38] sm:$0xff]   ;;  %v1800_v48 = vld [vmem:[%s2824_s1 + $0x40] sm:$0xff]  }
   0x9   :  { %1838 = vmatpush3.bf16.msra.mxu0 %v1903_v6  ;;  %v1910_v25 = vld [vmem:[%s2842_s29] sm:$0xff]   ;;  %v1752_v35 = vunpack.c.h.bf16 %v1797_v30  ;;  %v1751_v36 = vunpack.c.l.bf16 %v1797_v30  ;;  %v1756_v38 = vunpack.c.h.bf16 %v1798_v32  ;;  %v1755_v41 = vunpack.c.l.bf16 %v1798_v32 }
   0xa   :  { %1839 = vmatprep.subr.bf16.mxu0 %v1904_v12  ;;  %1851 = vmatprep.mubr.bf16.mxu0 %v1910_v25  ;;  %v927_v33 = vsel %vm899_vm0, %v1748_v28, 0.0  ;;  %v924_v34 = vsel %vm899_vm0, %v1747_v29, 0.0  ;;  %v1760_v46 = vunpack.c.h.bf16 %v1799_v42  ;;  %v1759_v47 = vunpack.c.l.bf16 %v1799_v42 }
   0xb   :  { %916 = vadd.xlane.f32.xlu1 %v915_v13  ;;  %v933_v39 = vsel %vm899_vm0, %v1752_v35, 0.0  ;;  %v930_v40 = vsel %vm899_vm0, %v1751_v36, 0.0  ;;  %v939_v43 = vsel %vm899_vm0, %v1756_v38, 0.0  ;;  %v936_v45 = vsel %vm899_vm0, %v1755_v41, 0.0 }
   0xc   :  { %904 = vadd.xlane.f32.xlu0 %v903_v14 }
   0xd   :  { %1840 = vmatpush3.bf16.msra.mxu0 %v1904_v12 }
   0xe   :  { %1841 = vmatprep.subr.bf16.mxu0 %v1905_v18 }
   0xf   :  { %910 = vadd.xlane.f32.xlu1 %v909_v19 }
  0x10   :  { %907 = vadd.xlane.f32.xlu0 %v906_v20 }
  0x11   :  { %1842 = vmatpush3.bf16.msra.mxu0 %v1905_v18 }
  0x12   :  { %1843 = vmatprep.subr.bf16.mxu0 %v1906_v24 }
  0x13   :  { %922 = vadd.xlane.f32.xlu1 %v921_v26 }
  0x14   :  { %919 = vadd.xlane.f32.xlu0 %v918_v27 }
  0x15   :  { %1844 = vmatpush3.bf16.msra.mxu0 %v1906_v24 }
  0x16   :  { %1845 = vmatprep.subr.bf16.mxu0 %v1907_v31 }
  0x17   :  { %928 = vadd.xlane.f32.xlu1 %v927_v33 }
  0x18   :  { %925 = vadd.xlane.f32.xlu0 %v924_v34 }
  0x19   :  { %1846 = vmatpush3.bf16.msra.mxu0 %v1907_v31 }
  0x1a   :  { %1847 = vmatprep.subr.bf16.mxu0 %v1908_v37 }
  0x1b   :  { %934 = vadd.xlane.f32.xlu1 %v933_v39 }
  0x1c   :  { %931 = vadd.xlane.f32.xlu0 %v930_v40 }
  0x1d   :  { %1848 = vmatpush3.bf16.msra.mxu0 %v1908_v37 }
  0x1e   :  { %1849 = vmatprep.subr.bf16.mxu0 %v1909_v44 }
  0x1f   :  { %940 = vadd.xlane.f32.xlu1 %v939_v43 }
  0x20   :  { %937 = vadd.xlane.f32.xlu0 %v936_v45 }
  0x21   :  { %23 = vsyncpa [#allocation4], 0  ;;  %v945_v49 = vsel %vm899_vm0, %v1760_v46, 0.0  ;;  %v942_v50 = vsel %vm899_vm0, %v1759_v47, 0.0  ;;  %v1911_v51 = vld [vmem:[%s2842_s29 + $0x8] sm:$0xff]   ;;  %v1764_v52 = vunpack.c.h.bf16 %v1800_v48  ;;  %v1763_v53 = vunpack.c.l.bf16 %v1800_v48  ;;  %1850 = vmatpush3.bf16.msra.mxu0 %v1909_v44  ;;  %v1912_v55 = vld [vmem:[%s2842_s29 + $0x10] sm:$0xff]  }
  0x22   :  { %v1801_v54 = vld [vmem:[%s2824_s1 + $0x48] sm:$0xff]   ;;  %v1802_v60 = vld [vmem:[%s2824_s1 + $0x50] sm:$0xff]   ;;  %v1913_v1 = vld [vmem:[%s2842_s29 + $0x18] sm:$0xff]   ;;  %v2015_v34 = vmov 0.0   ;;  %vm2016_vm1 = vmmov 0   ;;  %v605_v46 = vlaneseq  ;;  %vm1114_vm2 = vcmask 130112  }
  0x23   :  { %946 = vadd.xlane.f32.xlu1 %v945_v49  ;;  %v951_v56 = vsel %vm899_vm0, %v1764_v52, 0.0  ;;  %v948_v57 = vsel %vm899_vm0, %v1763_v53, 0.0  ;;  %v1768_v58 = vunpack.c.h.bf16 %v1801_v54  ;;  %v1767_v59 = vunpack.c.l.bf16 %v1801_v54  ;;  %v1803_v2 = vld [vmem:[%s2824_s1 + $0x58] sm:$0xff]   ;;  %v1914_v3 = vld [vmem:[%s2842_s29 + $0x20] sm:$0xff]   ;;  %v1915_v13 = vld [vmem:[%s2842_s29 + $0x28] sm:$0xff]   ;;  %1867 = vmatprep.subr.bf16.mxu1 %v2015_v34  ;;  %s2018_s24 = smov [#allocation3]  }
  0x24   :  { %943 = vadd.xlane.f32.xlu0 %v942_v50  ;;  %1852 = vmatmul.mubr.bf16.vlgmr.msra.gmra.mrb[0].mxu0 %v1911_v51  ;;  %v1772_v63 = vunpack.c.h.bf16 %v1802_v60  ;;  %v1771_v0 = vunpack.c.l.bf16 %v1802_v60  ;;  %v1776_v6 = vunpack.c.h.bf16 %v1803_v2  ;;  %v1775_v7 = vunpack.c.l.bf16 %v1803_v2  ;;  %v1804_v8 = vld [vmem:[%s2824_s1 + $0x60] sm:$0xff]   ;;  %v1805_v14 = vld [vmem:[%s2824_s1 + $0x68] sm:$0xff]   ;;  %v1916_v15 = vld [vmem:[%s2842_s29 + $0x30] sm:$0xff]  }
  0x25   :  { %1855 = vmatprep.mubr.bf16.mxu0 %v1912_v55  ;;  %v957_v61 = vsel %vm899_vm0, %v1768_v58, 0.0  ;;  %v954_v62 = vsel %vm899_vm0, %v1767_v59, 0.0  ;;  %v1780_v11 = vunpack.c.h.bf16 %v1804_v8  ;;  %v1779_v12 = vunpack.c.l.bf16 %v1804_v8  ;;  %v1806_v20 = vld [vmem:[%s2824_s1 + $0x70] sm:$0xff]   ;;  %v1917_v25 = vld [vmem:[%s2842_s29 + $0x38] sm:$0xff]   ;;  %v1918_v33 = vld [vmem:[%s2831_s8] sm:$0xff]   ;;  %1871 = vmatprep.mubr.msk.bf16.mxu1 %vm2016_vm1, %v2015_v34 }
  0x26   :  { %v963_v4 = vsel %vm899_vm0, %v1772_v63, 0.0  ;;  %v960_v5 = vsel %vm899_vm0, %v1771_v0, 0.0  ;;  %v969_v9 = vsel %vm899_vm0, %v1776_v6, 0.0  ;;  %v966_v10 = vsel %vm899_vm0, %v1775_v7, 0.0  ;;  %v1807_v26 = vld [vmem:[%s2824_s1 + $0x78] sm:$0xff]   ;;  %1868 = vmatpush3.bf16.msra.mxu1 %v1918_v33  ;;  %v1919_v35 = vld [vmem:[%s2831_s8 + $0x8] sm:$0xff]  }
  0x27   :  { %952 = vadd.xlane.f32.xlu1 %v951_v56  ;;  %v975_v16 = vsel %vm899_vm0, %v1780_v11, 0.0  ;;  %v972_v17 = vsel %vm899_vm0, %v1779_v12, 0.0  ;;  %v1784_v18 = vunpack.c.h.bf16 %v1805_v14  ;;  %v1783_v19 = vunpack.c.l.bf16 %v1805_v14  ;;  %1869 = vmatprep.subr.bf16.mxu1 %v2015_v34  ;;  %s1686_s1 = sshll.u32 %s2018_s24, 4  ;;  %s1687_s1 = int_to_ptr.vmem [resolvable:$true] %s1686_s1 }
  0x28   :  { %949 = vadd.xlane.f32.xlu0 %v948_v57  ;;  %v1788_v23 = vunpack.c.h.bf16 %v1806_v20  ;;  %v1787_v24 = vunpack.c.l.bf16 %v1806_v20  ;;  %v1792_v29 = vunpack.c.h.bf16 %v1807_v26  ;;  %v1791_v30 = vunpack.c.l.bf16 %v1807_v26  ;;  %s1991_s25 = scalar_lea.vmem %s1687_s1, 128  ;;  %p1996_p1 = scmp.lt.s32.totalorder %s1687_s1, %s1687_s1 }
  0x29   :  { %v981_v21 = vsel %vm899_vm0, %v1784_v18, 0.0  ;;  %v978_v22 = vsel %vm899_vm0, %v1783_v19, 0.0  ;;  %v1104_v51 = vand.u32 127, %v605_v46  ;;  %v2246_v56 = vshrl.u32 %v605_v46, 7  ;;  %p1992_p0 = scmp.ne.s32.totalorder %s1687_s1, %s1991_s25  ;;  %p1997_p2 = scmp.lt.s32.totalorder %s1991_s25, %s1991_s25 }
  0x2a   :  { %v987_v27 = vsel %vm899_vm0, %v1788_v23, 0.0  ;;  %v984_v28 = vsel %vm899_vm0, %v1787_v24, 0.0  ;;  %v993_v31 = vsel %vm899_vm0, %v1792_v29, 0.0  ;;  %v990_v32 = vsel %vm899_vm0, %v1791_v30, 0.0  ;;  %1870 = vmatpush3.bf16.msra.mxu1 %v1919_v35 }
  0x2b   :  { %958 = vadd.xlane.f32.xlu1 %v957_v61  ;;  %1875 = vmatprep.subr.bf16.mxu1 %v2015_v34  ;;  %v1109_v60 = vadd.s32 4294967288, %v1104_v51  ;;  %v2249_v2 = vsub.s32 %v1104_v51, %v2246_v56  ;;  %v1123_v8 = vadd.s32 4294967272, %v1104_v51  ;;  %vm1121_vm3 = vcmask 195712   ;;  %p1998_p3 = por %p1997_p2, %p1996_p1 }
  0x2c   :  { %955 = vadd.xlane.f32.xlu0 %v954_v62  ;;  %1856 = vmatmul.mubr.bf16.gmra.mrb[4].mxu0 %v1913_v1  ;;  %vm1128_vm4 = vcmask 261312   ;;  %vm1263_vm5 = vcmask 1041409   ;;  %vm1265_vm6 = vcmask 1042434   ;;  %vm1267_vm7 = vcmask 1043459  }
  0x2d   :  { %1859 = vmatprep.mubr.bf16.mxu0 %v1914_v3  ;;  %v2252_v7 = vsub.s32 %v1109_v60, %v2246_v56  ;;  %v2259_v19 = vsub.s32 %v1123_v8, %v2246_v56  ;;  %vm1269_vm8 = vcmask 1044484   ;;  %vm1271_vm9 = vcmask 1045509   ;;  %p1999_p4 = pnand %p1998_p3, %p1992_p0 }
  0x2e   :  { %vm1273_vm10 = vcmask 1046534   ;;  %vm1275_vm11 = vcmask 1047559   ;;  %vm289_vm12 = vcmask 261120  }
  0x2f   :  { %964 = vadd.xlane.f32.xlu1 %v963_v4  ;;  %v1116_v4 = vadd.s32 4294967280, %v1104_v51 }
  0x30   :  { %961 = vadd.xlane.f32.xlu0 %v960_v5 }
  0x33   :  { %970 = vadd.xlane.f32.xlu1 %v969_v9 }
  0x34   :  { %967 = vadd.xlane.f32.xlu0 %v966_v10  ;;  %1860 = vmatmul.mubr.bf16.gmra.mrb[8].mxu0 %v1915_v13 }
  0x35   :  { %1863 = vmatprep.mubr.bf16.mxu0 %v1916_v15 }
  0x37   :  { %976 = vadd.xlane.f32.xlu1 %v975_v16 }
  0x38   :  { %973 = vadd.xlane.f32.xlu0 %v972_v17  ;;  %v2255_v17 = vsub.s32 %v1116_v4, %v2246_v56 }
  0x3b   :  { %982 = vadd.xlane.f32.xlu1 %v981_v21 }
  0x3c   :  { %979 = vadd.xlane.f32.xlu0 %v978_v22  ;;  %1864 = vmatmul.mubr.bf16.gmra.mrb[12].mxu0 %v1917_v25 }
  0x3f   :  { %988 = vadd.xlane.f32.xlu1 %v987_v27 }
  0x40   :  { %985 = vadd.xlane.f32.xlu0 %v984_v28 }
  0x43   :  { %994 = vadd.xlane.f32.xlu1 %v993_v31 }
  0x44   :  { %991 = vadd.xlane.f32.xlu0 %v990_v32 }
  0x94   :  { %v914_v36 = vpop.xlane.xlu1 %913 }
  0x95   :  { %v902_v37 = vpop.xlane.xlu0 %901  ;;  %v1000_v49 = vmul.f32 0.0625, %v914_v36 }
  0x96   :  { %v996_v54 = vmul.f32 0.0625, %v902_v37 }
  0x98   :  { %v917_v38 = vpop.xlane.xlu1 %916 }
  0x99   :  { %v905_v39 = vpop.xlane.xlu0 %904  ;;  %v1001_v50 = vmul.f32 0.0625, %v917_v38 }
  0x9a   :  { %v997_v55 = vmul.f32 0.0625, %v905_v39 }
  0x9b   :  { %v1030_v59 = vpack.c.bf16 %v1001_v50, %v1000_v49 }
  0x9c   :  { %v911_v40 = vpop.xlane.xlu1 %910  ;;  %v1028_v63 = vpack.c.bf16 %v997_v55, %v996_v54 }
  0x9d   :  { %v908_v41 = vpop.xlane.xlu0 %907  ;;  %v999_v57 = vmul.f32 0.0625, %v911_v40  ;;  %v1075_v5 = vunpack.c.l.b16 %v1030_v59  ;;  %v1076_v6 = vunpack.c.h.b16 %v1030_v59 }
  0x9e   :  { %v998_v58 = vmul.f32 0.0625, %v908_v41  ;;  %v1071_v11 = vunpack.c.l.b16 %v1028_v63  ;;  %v1072_v15 = vunpack.c.h.b16 %v1028_v63 }
  0x9f   :  { %v1133_v18 = vrot.slane %v1075_v5, %v2249_v2  ;;  %v1137_v22 = vrot.slane %v1076_v6, %v2252_v7 }
  0xa0   :  { %v923_v42 = vpop.xlane.xlu1 %922  ;;  %v1029_v3 = vpack.c.bf16 %v999_v57, %v998_v58  ;;  %v1108_v23 = vrot.slane %v1071_v11, %v2249_v2  ;;  %v1113_v26 = vrot.slane %v1072_v15, %v2252_v7 }
  0xa1   :  { %v920_v43 = vpop.xlane.xlu0 %919  ;;  %v1003_v0 = vmul.f32 0.0625, %v923_v42  ;;  %v1138_v40 = vsel %vm1114_vm2, %v1137_v22, %v1133_v18 }
  0xa2   :  { %v1002_v1 = vmul.f32 0.0625, %v920_v43  ;;  %v1073_v16 = vunpack.c.l.b16 %v1029_v3  ;;  %v1074_v27 = vunpack.c.h.b16 %v1029_v3  ;;  %v1115_v41 = vsel %vm1114_vm2, %v1113_v26, %v1108_v23 }
  0xa4   :  { %v929_v44 = vpop.xlane.xlu1 %928  ;;  %v1031_v12 = vpack.c.bf16 %v1003_v0, %v1002_v1  ;;  %v1120_v30 = vrot.slane %v1073_v16, %v2255_v17  ;;  %v1127_v42 = vrot.slane %v1074_v27, %v2259_v19 }
  0xa5   :  { %v926_v45 = vpop.xlane.xlu0 %925  ;;  %v1005_v13 = vmul.f32 0.0625, %v929_v44 }
  0xa6   :  { %v1004_v14 = vmul.f32 0.0625, %v926_v45  ;;  %v1077_v24 = vunpack.c.l.b16 %v1031_v12  ;;  %v1078_v36 = vunpack.c.h.b16 %v1031_v12  ;;  %v1122_v44 = vsel %vm1121_vm3, %v1120_v30, %v1115_v41 }
  0xa8   :  { %v935_v47 = vpop.xlane.xlu1 %934  ;;  %v1032_v25 = vpack.c.bf16 %v1005_v13, %v1004_v14  ;;  %v1142_v37 = vrot.slane %v1077_v24, %v2255_v17  ;;  %v1147_v55 = vrot.slane %v1078_v36, %v2259_v19 }
  0xa9   :  { %v932_v48 = vpop.xlane.xlu0 %931  ;;  %v1007_v31 = vmul.f32 0.0625, %v935_v47 }
  0xaa   :  { %v1006_v32 = vmul.f32 0.0625, %v932_v48  ;;  %v1079_v38 = vunpack.c.l.b16 %v1032_v25  ;;  %v1080_v39 = vunpack.c.h.b16 %v1032_v25  ;;  %v1143_v54 = vsel %vm1121_vm3, %v1142_v37, %v1138_v40 }
  0xac   :  { %v941_v52 = vpop.xlane.xlu1 %940  ;;  %v1033_v45 = vpack.c.bf16 %v1007_v31, %v1006_v32  ;;  %v1152_v57 = vrot.slane %v1079_v38, %v2249_v2  ;;  %v1156_v58 = vrot.slane %v1080_v39, %v2252_v7 }
  0xad   :  { %v938_v53 = vpop.xlane.xlu0 %937  ;;  %v1009_v28 = vmul.f32 0.0625, %v941_v52 }
  0xae   :  { %v1008_v29 = vmul.f32 0.0625, %v938_v53  ;;  %v1081_v4 = vunpack.c.l.b16 %v1033_v45  ;;  %v1157_v11 = vsel %vm1114_vm2, %v1156_v58, %v1152_v57  ;;  %v1082_v14 = vunpack.c.h.b16 %v1033_v45 }
  0xb0   :  { %v947_v61 = vpop.xlane.xlu1 %946  ;;  %v1034_v43 = vpack.c.bf16 %v1009_v28, %v1008_v29  ;;  %v1161_v24 = vrot.slane %v1081_v4, %v2255_v17 }
  0xb1   :  { %v944_v62 = vpop.xlane.xlu0 %943  ;;  %v1011_v48 = vmul.f32 0.0625, %v947_v61 }
  0xb2   :  { %v1010_v49 = vmul.f32 0.0625, %v944_v62  ;;  %v1083_v59 = vunpack.c.l.b16 %v1034_v43  ;;  %v1084_v60 = vunpack.c.h.b16 %v1034_v43  ;;  %v2275_v62 = vsel %vm1128_vm4, %v1127_v42, %v1122_v44 }
  0xb4   :  { %v953_v9 = vpop.xlane.xlu1 %952  ;;  %v1035_v5 = vpack.c.bf16 %v1011_v48, %v1010_v49  ;;  %v1171_v15 = vrot.slane %v1083_v59, %v2249_v2  ;;  %v1175_v16 = vrot.slane %v1084_v60, %v2252_v7 }
  0xb5   :  { %v950_v10 = vpop.xlane.xlu0 %949  ;;  %v1013_v46 = vmul.f32 0.0625, %v953_v9 }
  0xb6   :  { %v1012_v47 = vmul.f32 0.0625, %v950_v10  ;;  %v2278_v10 = vsel %vm1128_vm4, %v1147_v55, %v1143_v54  ;;  %v1085_v25 = vunpack.c.l.b16 %v1035_v5  ;;  %v1176_v36 = vsel %vm1114_vm2, %v1175_v16, %v1171_v15 }
  0xb7   :  { %v1086_v37 = vunpack.c.h.b16 %v1035_v5 }
  0xb8   :  { %v959_v20 = vpop.xlane.xlu1 %958  ;;  %v1036_v1 = vpack.c.bf16 %v1013_v46, %v1012_v47  ;;  %v1180_v43 = vrot.slane %v1085_v25, %v2255_v17 }
  0xb9   :  { %v956_v21 = vpop.xlane.xlu0 %955  ;;  %v1015_v63 = vmul.f32 0.0625, %v959_v20  ;;  %v1185_v58 = vrot.slane %v1086_v37, %v2259_v19 }
  0xba   :  { %v1014_v0 = vmul.f32 0.0625, %v956_v21  ;;  %v1087_v20 = vunpack.c.l.b16 %v1036_v1  ;;  %v1088_v21 = vunpack.c.h.b16 %v1036_v1 }
  0xbc   :  { %v965_v33 = vpop.xlane.xlu1 %964  ;;  %v1037_v18 = vpack.c.bf16 %v1015_v63, %v1014_v0  ;;  %v1190_v39 = vrot.slane %v1087_v20, %v2249_v2  ;;  %v1194_v40 = vrot.slane %v1088_v21, %v2252_v7  ;;  %v1181_v0 = vsel %vm1121_vm3, %v1180_v43, %v1176_v36 }
  0xbd   :  { %v962_v35 = vpop.xlane.xlu0 %961  ;;  %v1017_v50 = vmul.f32 0.0625, %v965_v33 }
  0xbe   :  { %v1016_v51 = vmul.f32 0.0625, %v962_v35  ;;  %v1166_v35 = vrot.slane %v1082_v14, %v2259_v19  ;;  %v1089_v38 = vunpack.c.l.b16 %v1037_v18  ;;  %v1090_v44 = vunpack.c.h.b16 %v1037_v18 }
  0xbf   :  { %v1195_v59 = vsel %vm1114_vm2, %v1194_v40, %v1190_v39 }
  0xc0   :  { %v971_v52 = vpop.xlane.xlu1 %970  ;;  %v1038_v6 = vpack.c.bf16 %v1017_v50, %v1016_v51  ;;  %v1199_v54 = vrot.slane %v1089_v38, %v2255_v17 }
  0xc1   :  { %v968_v53 = vpop.xlane.xlu0 %967  ;;  %v1019_v3 = vmul.f32 0.0625, %v971_v52 }
  0xc2   :  { %v1018_v61 = vmul.f32 0.0625, %v968_v53  ;;  %v1091_v26 = vunpack.c.l.b16 %v1038_v6  ;;  %v1092_v27 = vunpack.c.h.b16 %v1038_v6  ;;  %v1162_v53 = vsel %vm1121_vm3, %v1161_v24, %v1157_v11 }
  0xc3   :  { %v1204_v6 = vrot.slane %v1090_v44, %v2259_v19  ;;  %v1167_v16 = vsel %vm1128_vm4, %v1166_v35, %v1162_v53 }
  0xc4   :  { %v977_v8 = vpop.xlane.xlu1 %976  ;;  %v1039_v22 = vpack.c.bf16 %v1019_v3, %v1018_v61  ;;  %v1209_v45 = vrot.slane %v1091_v26, %v2249_v2  ;;  %v1213_v46 = vrot.slane %v1092_v27, %v2252_v7  ;;  %v1264_v26 = vsel %vm1263_vm5, %v2278_v10, %v2275_v62 }
  0xc5   :  { %v974_v9 = vpop.xlane.xlu0 %973  ;;  %v1021_v12 = vmul.f32 0.0625, %v977_v8 }
  0xc6   :  { %v1020_v13 = vmul.f32 0.0625, %v974_v9  ;;  %v1093_v41 = vunpack.c.l.b16 %v1039_v22  ;;  %v1094_v55 = vunpack.c.h.b16 %v1039_v22  ;;  %v1214_v1 = vsel %vm1114_vm2, %v1213_v46, %v1209_v45 }
  0xc7   :  { %v1186_v22 = vsel %vm1128_vm4, %v1185_v58, %v1181_v0 }
  0xc8   :  { %v1040_v23 = vpack.c.bf16 %v1021_v12, %v1020_v13  ;;  %v983_v28 = vpop.xlane.xlu1 %982  ;;  %v1218_v60 = vrot.slane %v1093_v41, %v2255_v17  ;;  %v1200_v12 = vsel %vm1121_vm3, %v1199_v54, %v1195_v59  ;;  %v1223_v13 = vrot.slane %v1094_v55, %v2259_v19 }
  0xc9   :  { %v980_v29 = vpop.xlane.xlu0 %979  ;;  %v1023_v32 = vmul.f32 0.0625, %v983_v28  ;;  %v1205_v27 = vsel %vm1128_vm4, %v1204_v6, %v1200_v12 }
  0xca   :  { %v1095_v30 = vunpack.c.l.b16 %v1040_v23  ;;  %v1096_v31 = vunpack.c.h.b16 %v1040_v23  ;;  %v1022_v33 = vmul.f32 0.0625, %v980_v29  ;;  %v1219_v18 = vsel %vm1121_vm3, %v1218_v60, %v1214_v1 }
  0xcc   :  { %v1041_v42 = vpack.c.bf16 %v1023_v32, %v1022_v33  ;;  %v989_v47 = vpop.xlane.xlu1 %988  ;;  %v1228_v49 = vrot.slane %v1095_v30, %v2249_v2  ;;  %v1232_v50 = vrot.slane %v1096_v31, %v2252_v7  ;;  %v1266_v30 = vsel %vm1265_vm6, %v1167_v16, %v1264_v26 }
  0xcd   :  { %v986_v48 = vpop.xlane.xlu0 %985  ;;  %v1025_v52 = vmul.f32 0.0625, %v989_v47  ;;  %v1224_v31 = vsel %vm1128_vm4, %v1223_v13, %v1219_v18  ;;  %v1268_v33 = vsel %vm1267_vm7, %v1186_v22, %v1266_v30 }
  0xce   :  { %v1097_v51 = vunpack.c.l.b16 %v1041_v42  ;;  %v1024_v57 = vmul.f32 0.0625, %v986_v48  ;;  %v1098_v63 = vunpack.c.h.b16 %v1041_v42  ;;  %v1233_v8 = vsel %vm1114_vm2, %v1232_v50, %v1228_v49 }
  0xcf   :  { %v1270_v62 = vsel %vm1269_vm8, %v1205_v27, %v1268_v33 }
  0xd0   :  { %v1237_v3 = vrot.slane %v1097_v51, %v2255_v17  ;;  %v1042_v61 = vpack.c.bf16 %v1025_v52, %v1024_v57  ;;  %v995_v4 = vpop.xlane.xlu1 %994  ;;  %v1242_v20 = vrot.slane %v1098_v63, %v2259_v19  ;;  %v1272_v38 = vsel %vm1271_vm9, %v1224_v31, %v1270_v62 }
  0xd1   :  { %v992_v5 = vpop.xlane.xlu0 %991  ;;  %v1027_v9 = vmul.f32 0.0625, %v995_v4 }
  0xd2   :  { %v1026_v11 = vmul.f32 0.0625, %v992_v5  ;;  %v1099_v14 = vunpack.c.l.b16 %v1042_v61  ;;  %v1100_v15 = vunpack.c.h.b16 %v1042_v61  ;;  %v1238_v23 = vsel %vm1121_vm3, %v1237_v3, %v1233_v8 }
  0xd3   :  { %v1243_v35 = vsel %vm1128_vm4, %v1242_v20, %v1238_v23 }
  0xd4   :  { %v1043_v21 = vpack.c.bf16 %v1027_v9, %v1026_v11  ;;  %v1247_v24 = vrot.slane %v1099_v14, %v2249_v2  ;;  %v1251_v25 = vrot.slane %v1100_v15, %v2252_v7  ;;  %v1274_v40 = vsel %vm1273_vm10, %v1243_v35, %v1272_v38 }
  0xd6   :  { %v1101_v28 = vunpack.c.l.b16 %v1043_v21  ;;  %v1102_v29 = vunpack.c.h.b16 %v1043_v21  ;;  %v1252_v32 = vsel %vm1114_vm2, %v1251_v25, %v1247_v24 }
  0xd8   :  { %v1256_v36 = vrot.slane %v1101_v28, %v2255_v17  ;;  %v1261_v37 = vrot.slane %v1102_v29, %v2259_v19  ;;  %v2335_v17 = vld [vmem:[%s2828_s5] ss:$0 sm:$0xff] }
  0xda   :  { %v1257_v10 = vsel %vm1121_vm3, %v1256_v36, %v1252_v32 }
  0xdb   :  { %v1262_v39 = vsel %vm1128_vm4, %v1261_v37, %v1257_v10 }
  0xdc   :  { %v1276_v41 = vsel %vm1275_vm11, %v1262_v39, %v1274_v40 }
  0xdd   :  { %v1277_v42 = vpack.c.b16 %v1276_v41, %v1276_v41 }
  0xdf   :  { %1872 = vmatmul.mubr.msk.bf16.vlgmr.msra.gmra.mrb[0].mxu1 %vm289_vm12, %v1277_v42 }
  0xe0   :  { %1879 = vmatprep.mubr.msk.bf16.mxu1 %vm2016_vm1, %v2015_v34 }
  0xf7   :  { %v1853_v19 = vpop.f32.mrb[0].mxu0 }
  0xf8   :  { %v2338_v43 = vadd.f32 %v1853_v19, %v2335_v17  ;;  %v226_v44 = vpop.f32.mrb[1].mxu0 }
  0xf9   :  { %v1854_v45 = vpop.f32.mrb[2].mxu0  ;;  %v2341_v46 = vadd.f32 %v2335_v17, %v226_v44 }
  0xfa   :  { %v2344_v47 = vadd.f32 %v1854_v45, %v2335_v17  ;;  %v229_v48 = vpop.f32.mrb[3].mxu0  ;;  %v296_v49 = vsel %vm289_vm12, %v2338_v43, 0.0  ;;  %v357_v53 = vmul.f32 %v2338_v43, %v2338_v43 }
  0xfb   :  { %297 = vadd.xlane.f32.xlu0 %v296_v49  ;;  %v2349_v50 = vadd.f32 %v2335_v17, %v229_v48  ;;  %v290_v52 = vsel %vm289_vm12, %v2341_v46, 0.0  ;;  %v355_v0 = vmul.f32 %v2341_v46, %v2341_v46 }
  0xfc   :  { %v299_v51 = vsel %vm289_vm12, %v2344_v47, 0.0  ;;  %v358_v58 = vmul.f32 %v2344_v47, %v2344_v47  ;;  %v377_v60 = vsel %vm289_vm12, %v357_v53, 0.0 }
  0xfd   :  { %300 = vadd.xlane.f32.xlu1 %v299_v51  ;;  %v293_v55 = vsel %vm289_vm12, %v2349_v50, 0.0  ;;  %v356_v61 = vmul.f32 %v2349_v50, %v2349_v50  ;;  %v371_v4 = vsel %vm289_vm12, %v355_v0, 0.0 }
  0xfe   :  { %v380_v3 = vsel %vm289_vm12, %v358_v58, 0.0 }
  0xff   :  { %291 = vadd.xlane.f32.xlu0 %v290_v52  ;;  %v1857_v54 = vpop.f32.mrb[4].mxu0  ;;  %v374_v8 = vsel %vm289_vm12, %v356_v61, 0.0 }
 0x100   :  { %v242_v57 = vpop.f32.mrb[5].mxu0  ;;  %v2365_v1 = vadd.f32 %v1857_v54, %v2335_v17 }
 0x101   :  { %294 = vadd.xlane.f32.xlu1 %v293_v55  ;;  %v1858_v59 = vpop.f32.mrb[6].mxu0  ;;  %v2378_v13 = vadd.f32 %v2335_v17, %v242_v57 }
 0x102   :  { %v245_v63 = vpop.f32.mrb[7].mxu0  ;;  %v2372_v6 = vadd.f32 %v1858_v59, %v2335_v17  ;;  %v308_v9 = vsel %vm289_vm12, %v2365_v1, 0.0  ;;  %v361_v20 = vmul.f32 %v2365_v1, %v2365_v1 }
 0x103   :  { %378 = vadd.xlane.f32.xlu0 %v377_v60  ;;  %v2381_v15 = vadd.f32 %v2335_v17, %v245_v63  ;;  %v302_v18 = vsel %vm289_vm12, %v2378_v13, 0.0  ;;  %v359_v27 = vmul.f32 %v2378_v13, %v2378_v13 }
 0x104   :  { %v311_v16 = vsel %vm289_vm12, %v2372_v6, 0.0  ;;  %v362_v23 = vmul.f32 %v2372_v6, %v2372_v6  ;;  %v389_v26 = vsel %vm289_vm12, %v361_v20, 0.0 }
 0x105   :  { %381 = vadd.xlane.f32.xlu1 %v380_v3  ;;  %v305_v22 = vsel %vm289_vm12, %v2381_v15, 0.0  ;;  %v360_v31 = vmul.f32 %v2381_v15, %v2381_v15  ;;  %v383_v32 = vsel %vm289_vm12, %v359_v27, 0.0 }
 0x106   :  { %v392_v30 = vsel %vm289_vm12, %v362_v23, 0.0 }
 0x107   :  { %372 = vadd.xlane.f32.xlu0 %v371_v4  ;;  %v1861_v5 = vpop.f32.mrb[8].mxu0  ;;  %v386_v35 = vsel %vm289_vm12, %v360_v31, 0.0 }
 0x108   :  { %v258_v11 = vpop.f32.mrb[9].mxu0  ;;  %v2397_v29 = vadd.f32 %v1861_v5, %v2335_v17 }
 0x109   :  { %375 = vadd.xlane.f32.xlu1 %v374_v8  ;;  %v1862_v12 = vpop.f32.mrb[10].mxu0  ;;  %v2410_v37 = vadd.f32 %v2335_v17, %v258_v11  ;;  %v1920_v8 = vld [vmem:[%s2836_s13] sm:$0xff]   ;;  %v2017_v11 = vmov 0  }
 0x10a   :  { %v261_v14 = vpop.f32.mrb[11].mxu0  ;;  %v2404_v33 = vadd.f32 %v1862_v12, %v2335_v17  ;;  %v320_v36 = vsel %vm289_vm12, %v2397_v29, 0.0  ;;  %v365_v39 = vmul.f32 %v2397_v29, %v2397_v29  ;;  %1876 = vmatpush3.bf16.msra.mxu1 %v1920_v8  ;;  %1901 = vset.pattern.permute.xlu0 %v2017_v11 }
 0x10b   :  { %309 = vadd.xlane.f32.xlu0 %v308_v9  ;;  %v2413_v62 = vadd.f32 %v2335_v17, %v261_v14  ;;  %v314_v38 = vsel %vm289_vm12, %v2410_v37, 0.0  ;;  %v363_v19 = vmul.f32 %v2410_v37, %v2410_v37  ;;  %v1921_v9 = vld [vmem:[%s2836_s13 + $0x8] sm:$0xff]   ;;  %1877 = vmatprep.subr.bf16.mxu1 %v2015_v34 }
 0x10c   :  { %v323_v10 = vsel %vm289_vm12, %v2404_v33, 0.0  ;;  %v366_v41 = vmul.f32 %v2404_v33, %v2404_v33  ;;  %v401_v42 = vsel %vm289_vm12, %v365_v39, 0.0 }
 0x10d   :  { %312 = vadd.xlane.f32.xlu1 %v311_v16  ;;  %v317_v40 = vsel %vm289_vm12, %v2413_v62, 0.0  ;;  %v364_v48 = vmul.f32 %v2413_v62, %v2413_v62  ;;  %v395_v49 = vsel %vm289_vm12, %v363_v19, 0.0 }
 0x10e   :  { %v404_v45 = vsel %vm289_vm12, %v366_v41, 0.0  ;;  %1878 = vmatpush3.bf16.msra.mxu1 %v1921_v9 }
 0x10f   :  { %303 = vadd.xlane.f32.xlu0 %v302_v18  ;;  %v1865_v21 = vpop.f32.mrb[12].mxu0  ;;  %v398_v52 = vsel %vm289_vm12, %v364_v48, 0.0  ;;  %1883 = vmatprep.subr.bf16.mxu1 %v2015_v34 }
 0x110   :  { %v274_v24 = vpop.f32.mrb[13].mxu0  ;;  %v2429_v44 = vadd.f32 %v1865_v21, %v2335_v17 }
 0x111   :  { %306 = vadd.xlane.f32.xlu1 %v305_v22  ;;  %v1866_v25 = vpop.f32.mrb[14].mxu0  ;;  %v2442_v54 = vadd.f32 %v2335_v17, %v274_v24 }
 0x112   :  { %v277_v28 = vpop.f32.mrb[15].mxu0  ;;  %v2436_v51 = vadd.f32 %v1866_v25, %v2335_v17  ;;  %v332_v53 = vsel %vm289_vm12, %v2429_v44, 0.0  ;;  %v369_v0 = vmul.f32 %v2429_v44, %v2429_v44 }
 0x113   :  { %390 = vadd.xlane.f32.xlu0 %v389_v26  ;;  %v2445_v55 = vadd.f32 %v2335_v17, %v277_v28  ;;  %v326_v58 = vsel %vm289_vm12, %v2442_v54, 0.0  ;;  %v367_v59 = vmul.f32 %v2442_v54, %v2442_v54 }
 0x114   :  { %v335_v57 = vsel %vm289_vm12, %v2436_v51, 0.0  ;;  %v370_v61 = vmul.f32 %v2436_v51, %v2436_v51  ;;  %v413_v4 = vsel %vm289_vm12, %v369_v0, 0.0 }
 0x115   :  { %393 = vadd.xlane.f32.xlu1 %v392_v30  ;;  %v329_v60 = vsel %vm289_vm12, %v2445_v55, 0.0  ;;  %v368_v63 = vmul.f32 %v2445_v55, %v2445_v55  ;;  %v407_v17 = vsel %vm289_vm12, %v367_v59, 0.0 }
 0x116   :  { %v416_v5 = vsel %vm289_vm12, %v370_v61, 0.0 }
 0x117   :  { %384 = vadd.xlane.f32.xlu0 %v383_v32  ;;  %v410_v3 = vsel %vm289_vm12, %v368_v63, 0.0 }
 0x119   :  { %387 = vadd.xlane.f32.xlu1 %v386_v35 }
 0x11b   :  { %321 = vadd.xlane.f32.xlu0 %v320_v36 }
 0x11d   :  { %324 = vadd.xlane.f32.xlu1 %v323_v10 }
 0x11f   :  { %315 = vadd.xlane.f32.xlu0 %v314_v38 }
 0x121   :  { %318 = vadd.xlane.f32.xlu1 %v317_v40 }
 0x123   :  { %402 = vadd.xlane.f32.xlu0 %v401_v42 }
 0x125   :  { %405 = vadd.xlane.f32.xlu1 %v404_v45 }
 0x127   :  { %396 = vadd.xlane.f32.xlu0 %v395_v49 }
 0x129   :  { %399 = vadd.xlane.f32.xlu1 %v398_v52 }
 0x12b   :  { %333 = vadd.xlane.f32.xlu0 %v332_v53 }
 0x12d   :  { %336 = vadd.xlane.f32.xlu1 %v335_v57 }
 0x12f   :  { %327 = vadd.xlane.f32.xlu0 %v326_v58 }
 0x131   :  { %330 = vadd.xlane.f32.xlu1 %v329_v60 }
 0x133   :  { %408 = vadd.xlane.f32.xlu0 %v407_v17 }
 0x135   :  { %411 = vadd.xlane.f32.xlu1 %v410_v3 }
 0x137   :  { %414 = vadd.xlane.f32.xlu0 %v413_v4 }
 0x139   :  { %417 = vadd.xlane.f32.xlu1 %v416_v5 }
 0x188   :  { %v298_v12 = vpop.xlane.xlu0 %297 }
 0x189   :  { %v341_v18 = vmul.f32 0.03125, %v298_v12 }
 0x18a   :  { %v301_v14 = vpop.xlane.xlu1 %300 }
 0x18b   :  { %v342_v21 = vmul.f32 0.03125, %v301_v14  ;;  %v437_v23 = vmul.f32 %v341_v18, %v341_v18  ;;  %v485_v9 = vsub.f32 %v2338_v43, %v341_v18 }
 0x18c   :  { %v292_v16 = vpop.xlane.xlu0 %291 }
 0x18d   :  { %v2473_v24 = vmul.f32 0.03125, %v292_v16  ;;  %v438_v28 = vmul.f32 %v342_v21, %v342_v21 }
 0x18e   :  { %v295_v20 = vpop.xlane.xlu1 %294 }
 0x18f   :  { %v2475_v26 = vmul.f32 0.03125, %v295_v20  ;;  %v435_v35 = vmul.f32 %v2473_v24, %v2473_v24 }
 0x190   :  { %v379_v22 = vpop.xlane.xlu0 %378 }
 0x191   :  { %v421_v25 = vmul.f32 0.03125, %v379_v22  ;;  %v436_v39 = vmul.f32 %v2475_v26, %v2475_v26 }
 0x192   :  { %v382_v27 = vpop.xlane.xlu1 %381 }
 0x193   :  { %v453_v30 = vsub.f32 %v421_v25, %v437_v23  ;;  %v422_v31 = vmul.f32 0.03125, %v382_v27  ;;  %v2497_v23 = vld [vmem:[%s2829_s6] ss:$0 sm:$0xff]  ;;  %v486_v25 = vsub.f32 %v2344_v47, %v342_v21 }
 0x194   :  { %v373_v32 = vpop.xlane.xlu0 %372 }
 0x195   :  { %v469_v36 = vmax.f32 %v453_v30, 0.0  ;;  %v454_v10 = vsub.f32 %v422_v31, %v438_v28  ;;  %v419_v38 = vmul.f32 0.03125, %v373_v32 }
 0x196   :  { %v376_v40 = vpop.xlane.xlu1 %375 }
 0x197   :  { %v501_v41 = vadd.f32 1e-05, %v469_v36  ;;  %v470_v42 = vmax.f32 %v454_v10, 0.0  ;;  %v451_v19 = vsub.f32 %v419_v38, %v435_v35  ;;  %v420_v45 = vmul.f32 0.03125, %v376_v40  ;;  %v601_v35 = vld [vmem:[%s2825_s2] sm:$0x1] }
 0x198   :  { %v310_v48 = vpop.xlane.xlu0 %309  ;;  %v483_v36 = vsub.f32 %v2341_v46, %v2473_v24 }
 0x199   :  { %1925 = vrsqrt.f32 %v501_v41  ;;  %v502_v49 = vadd.f32 1e-05, %v470_v42  ;;  %v467_v52 = vmax.f32 %v451_v19, 0.0  ;;  %v452_v53 = vsub.f32 %v420_v45, %v436_v39  ;;  %v2513_v19 = vld [vmem:[%s2830_s7] ss:$0 sm:$0xff] }
 0x19a   :  { %v313_v57 = vpop.xlane.xlu1 %312  ;;  %v2481_v17 = vmul.f32 0.03125, %v310_v48  ;;  %v484_v45 = vsub.f32 %v2349_v50, %v2475_v26  ;;  %v603_v48 = vpack.i.b16 %v601_v35, %v601_v35 }
 0x19b   :  { %1927 = vrsqrt.f32 %v502_v49  ;;  %v499_v58 = vadd.f32 1e-05, %v467_v52  ;;  %v468_v59 = vmax.f32 %v452_v53, 0.0  ;;  %v2483_v3 = vmul.f32 0.03125, %v313_v57 }
 0x19c   :  { %v304_v60 = vpop.xlane.xlu0 %303  ;;  %v441_v4 = vmul.f32 %v2481_v17, %v2481_v17 }
 0x19d   :  { %1929 = vrsqrt.f32 %v499_v58  ;;  %v500_v63 = vadd.f32 1e-05, %v468_v59  ;;  %v2487_v5 = vmul.f32 0.03125, %v304_v60  ;;  %v442_v14 = vmul.f32 %v2483_v3, %v2483_v3 }
 0x19e   :  { %v307_v0 = vpop.xlane.xlu1 %306 }
 0x19f   :  { %1931 = vrsqrt.f32 %v500_v63  ;;  %v2492_v16 = vmul.f32 0.03125, %v307_v0  ;;  %v439_v43 = vmul.f32 %v2487_v5, %v2487_v5  ;;  %v607_v0 = vsub.s32 0, %v2246_v56 }
 0x1a0   :  { %v391_v61 = vpop.xlane.xlu0 %390  ;;  %v489_v56 = vsub.f32 %v2365_v1, %v2481_v17 }
 0x1a1   :  { %v425_v8 = vmul.f32 0.03125, %v391_v61  ;;  %v440_v39 = vmul.f32 %v2492_v16, %v2492_v16 }
 0x1a2   :  { %v394_v11 = vpop.xlane.xlu1 %393 }
 0x1a3   :  { %v1926_v12 = vpop.eup %1925  ;;  %v457_v20 = vsub.f32 %v425_v8, %v441_v4  ;;  %v426_v22 = vmul.f32 0.03125, %v394_v11 }
 0x1a4   :  { %v385_v27 = vpop.xlane.xlu0 %384  ;;  %v533_v28 = vmul.f32 %v1926_v12, %v485_v9 }
 0x1a5   :  { %v1928_v30 = vpop.eup %1927  ;;  %v473_v18 = vmax.f32 %v457_v20, 0.0  ;;  %v458_v31 = vsub.f32 %v426_v22, %v442_v14  ;;  %v423_v32 = vmul.f32 0.03125, %v385_v27 }
 0x1a6   :  { %v388_v10 = vpop.xlane.xlu1 %387  ;;  %v534_v38 = vmul.f32 %v1928_v30, %v486_v25  ;;  %v556_v47 = vmul.f32 %v2497_v23, %v533_v28  ;;  %v2527_v25 = vrot.slane %v603_v48, %v607_v0  ;;  %v1714_v28 = vld [vmem:[%s2832_s9] ss:$0 sm:$0xff] }
 0x1a7   :  { %v1930_v21 = vpop.eup %1929  ;;  %v474_v40 = vmax.f32 %v458_v31, 0.0  ;;  %v455_v41 = vsub.f32 %v423_v32, %v439_v43  ;;  %v424_v42 = vmul.f32 0.03125, %v388_v10  ;;  %v505_v52 = vadd.f32 1e-05, %v473_v18 }
 0x1a8   :  { %v322_v46 = vpop.xlane.xlu0 %321  ;;  %v557_v24 = vmul.f32 %v2497_v23, %v534_v38  ;;  %v531_v58 = vmul.f32 %v1930_v21, %v483_v36  ;;  %v579_v60 = vadd.f32 %v2513_v19, %v556_v47  ;;  %v490_v43 = vsub.f32 %v2372_v6, %v2483_v3 }
 0x1a9   :  { %v1932_v49 = vpop.eup %1931  ;;  %v471_v53 = vmax.f32 %v455_v41, 0.0  ;;  %v456_v57 = vsub.f32 %v424_v42, %v440_v39  ;;  %v506_v4 = vadd.f32 1e-05, %v474_v40  ;;  %v2521_v50 = vmul.f32 0.03125, %v322_v46 }
 0x1aa   :  { %v325_v59 = vpop.xlane.xlu1 %324  ;;  %v580_v63 = vadd.f32 %v2513_v19, %v557_v24  ;;  %v532_v61 = vmul.f32 %v1932_v49, %v484_v45  ;;  %1933 = vrsqrt.f32 %v505_v52  ;;  %v554_v14 = vmul.f32 %v2497_v23, %v531_v58 }
 0x1ab   :  { %v472_v8 = vmax.f32 %v456_v57, 0.0  ;;  %v503_v12 = vadd.f32 1e-05, %v471_v53  ;;  %1935 = vrsqrt.f32 %v506_v4  ;;  %v2531_v27 = vmul.f32 0.03125, %v325_v59 }
 0x1ac   :  { %v316_v26 = vpop.xlane.xlu0 %315  ;;  %v2523_v9 = vpack.c.bf16 %v580_v63, %v579_v60  ;;  %v555_v11 = vmul.f32 %v2497_v23, %v532_v61  ;;  %v487_v18 = vsub.f32 %v2378_v13, %v2487_v5  ;;  %v445_v31 = vmul.f32 %v2521_v50, %v2521_v50 }
 0x1ad   :  { %v504_v20 = vadd.f32 1e-05, %v472_v8  ;;  %1937 = vrsqrt.f32 %v503_v12  ;;  %v2545_v36 = vmul.f32 0.03125, %v316_v26  ;;  %v577_v47 = vadd.f32 %v2513_v19, %v554_v14 }
 0x1ae   :  { %v319_v22 = vpop.xlane.xlu1 %318  ;;  %v578_v30 = vadd.f32 %v2513_v19, %v555_v11  ;;  %v682_v35 = vmul.bf16 %v2523_v9, %v2523_v9  ;;  %v488_v21 = vsub.f32 %v2381_v15, %v2492_v16  ;;  %v446_v45 = vmul.f32 %v2531_v27, %v2531_v27 }
 0x1af   :  { %1939 = vrsqrt.f32 %v504_v20  ;;  %v2550_v39 = vmul.f32 0.03125, %v319_v22  ;;  %v610_v60 = vmul.bf16 %v2527_v25, %v2523_v9  ;;  %v443_v63 = vmul.f32 %v2545_v36, %v2545_v36 }
 0x1b0   :  { %v403_v32 = vpop.xlane.xlu0 %402  ;;  %v2556_v49 = vpack.c.bf16 %v578_v30, %v577_v47  ;;  %v691_v59 = vunpack.c.l.bf16 %v682_v35  ;;  %v692_v12 = vunpack.c.h.bf16 %v682_v35 }
 0x1b1   :  { %v429_v38 = vmul.f32 0.03125, %v403_v32  ;;  %v444_v8 = vmul.f32 %v2550_v39, %v2550_v39  ;;  %v619_v47 = vunpack.c.l.bf16 %v610_v60 }
 0x1b2   :  { %v1327_v10 = vpop.f32.mrb[0].mxu1  ;;  %v406_v42 = vpop.xlane.xlu1 %405  ;;  %v681_v14 = vmul.bf16 %v2556_v49, %v2556_v49  ;;  %v711_v32 = vsel %vm289_vm12, %v691_v59, 0.0  ;;  %v491_v59 = vsub.f32 %v2410_v37, %v2545_v36 }
 0x1b3   :  { %v2552_v40 = vadd.f32 %v1714_v28, %v1327_v10  ;;  %v1873_v41 = vpop.f32.mrb[1].mxu1  ;;  %v461_v46 = vsub.f32 %v429_v38, %v445_v31  ;;  %v430_v48 = vmul.f32 0.03125, %v406_v42  ;;  %v620_v38 = vunpack.c.h.bf16 %v610_v60 }
 0x1b4   :  { %v1330_v24 = vpop.f32.mrb[2].mxu1  ;;  %v397_v57 = vpop.xlane.xlu0 %396  ;;  %v2574_v41 = vmul.bf16 %v2527_v25, %v2556_v49 }
 0x1b5   :  { %v1874_v52 = vpop.f32.mrb[3].mxu1  ;;  %v1333_v53 = vsel %vm289_vm12, %v2552_v40, 0.0  ;;  %v1337_v58 = vmul.f32 %v2552_v40, %v2552_v40  ;;  %v477_v0 = vmax.f32 %v461_v46, 0.0  ;;  %v462_v61 = vsub.f32 %v430_v48, %v446_v45  ;;  %v1934_v20 = vpop.eup %1933 }
 0x1b6   :  { %1334 = vadd.xlane.f32.xlu0 %v1333_v53  ;;  %v427_v4 = vmul.f32 0.03125, %v397_v57  ;;  %v400_v11 = vpop.xlane.xlu1 %399  ;;  %v1936_v42 = vpop.eup %1935  ;;  %v493_v24 = vsub.f32 %v2397_v29, %v2521_v50  ;;  %v494_v48 = vsub.f32 %v2404_v33, %v2531_v27  ;;  %v714_v52 = vsel %vm289_vm12, %v692_v12, 0.0 }
 0x1b7   :  { %v1338_v26 = vsel %vm289_vm12, %v1337_v58, 0.0  ;;  %v509_v22 = vadd.f32 1e-05, %v477_v0  ;;  %v478_v28 = vmax.f32 %v462_v61, 0.0  ;;  %v428_v31 = vmul.f32 0.03125, %v400_v11  ;;  %v1938_v58 = vpop.eup %1937 }
 0x1b8   :  { %v459_v30 = vsub.f32 %v427_v4, %v443_v63  ;;  %1339 = vadd.xlane.f32.xlu1 %v1338_v26  ;;  %v334_v10 = vpop.xlane.xlu0 %333  ;;  %v537_v57 = vmul.f32 %v1934_v20, %v489_v56  ;;  %v689_v0 = vunpack.c.l.bf16 %v681_v14  ;;  %v642_v4 = vsel %vm289_vm12, %v620_v38, 0.0 }
 0x1b9   :  { %1941 = vrsqrt.f32 %v509_v22  ;;  %v510_v35 = vadd.f32 1e-05, %v478_v28  ;;  %v460_v46 = vsub.f32 %v428_v31, %v444_v8  ;;  %v1940_v61 = vpop.eup %1939  ;;  %v639_v26 = vsel %vm289_vm12, %v619_v47, 0.0 }
 0x1ba   :  { %v475_v45 = vmax.f32 %v459_v30, 0.0  ;;  %712 = vadd.xlane.f32.xlu0 %v711_v32  ;;  %v337_v53 = vpop.xlane.xlu1 %336  ;;  %v690_v11 = vunpack.c.h.bf16 %v681_v14  ;;  %v538_v1 = vmul.f32 %v1936_v42, %v490_v43  ;;  %v2591_v56 = vmul.f32 0.03125, %v334_v10 }
 0x1bb   :  { %v476_v63 = vmax.f32 %v460_v46, 0.0  ;;  %1943 = vrsqrt.f32 %v510_v35  ;;  %v618_v12 = vunpack.c.h.bf16 %v2574_v41  ;;  %v560_v28 = vmul.f32 %v2497_v23, %v537_v57 }
 0x1bc   :  { %v507_v60 = vadd.f32 1e-05, %v475_v45  ;;  %715 = vadd.xlane.f32.xlu1 %v714_v52  ;;  %v328_v8 = vpop.xlane.xlu0 %327  ;;  %v561_v30 = vmul.f32 %v2497_v23, %v538_v1  ;;  %v2598_v14 = vmul.f32 0.03125, %v337_v53  ;;  %v705_v3 = vsel %vm289_vm12, %v689_v0, 0.0 }
 0x1bd   :  { %v508_v17 = vadd.f32 1e-05, %v476_v63  ;;  %v2594_v20 = vmul.f32 0.03125, %v328_v8  ;;  %v536_v43 = vmul.f32 %v1940_v61, %v488_v21  ;;  %v583_v32 = vadd.f32 %v2513_v19, %v560_v28 }
 0x1be   :  { %643 = vadd.xlane.f32.xlu0 %v642_v4  ;;  %1945 = vrsqrt.f32 %v507_v60  ;;  %v331_v22 = vpop.xlane.xlu1 %330  ;;  %v584_v10 = vadd.f32 %v2513_v19, %v561_v30  ;;  %v535_v38 = vmul.f32 %v1938_v58, %v487_v18  ;;  %v492_v47 = vsub.f32 %v2413_v62, %v2550_v39 }
 0x1bf   :  { %v2600_v6 = vmul.f32 0.03125, %v331_v22  ;;  %1947 = vrsqrt.f32 %v508_v17  ;;  %v447_v42 = vmul.f32 %v2594_v20, %v2594_v20  ;;  %v617_v15 = vunpack.c.l.bf16 %v2574_v41 }
 0x1c0   :  { %640 = vadd.xlane.f32.xlu1 %v639_v26  ;;  %v409_v31 = vpop.xlane.xlu0 %408  ;;  %v708_v16 = vsel %vm289_vm12, %v690_v11, 0.0  ;;  %v636_v45 = vsel %vm289_vm12, %v618_v12, 0.0  ;;  %v2618_v46 = vpack.c.bf16 %v584_v10, %v583_v32  ;;  %v559_v13 = vmul.f32 %v2497_v23, %v536_v43 }
 0x1c1   :  { %v431_v35 = vmul.f32 0.03125, %v409_v31  ;;  %v449_v18 = vmul.f32 %v2591_v56, %v2591_v56  ;;  %v448_v52 = vmul.f32 %v2600_v6, %v2600_v6  ;;  %v450_v41 = vmul.f32 %v2598_v14, %v2598_v14 }
 0x1c2   :  { %706 = vadd.xlane.f32.xlu0 %v705_v3  ;;  %v412_v21 = vpop.xlane.xlu1 %411  ;;  %v684_v60 = vmul.bf16 %v2618_v46, %v2618_v46  ;;  %v612_v63 = vmul.bf16 %v2527_v25, %v2618_v46  ;;  %v558_v0 = vmul.f32 %v2497_v23, %v535_v38  ;;  %v633_v26 = vsel %vm289_vm12, %v617_v15, 0.0 }
 0x1c3   :  { %v1942_v5 = vpop.eup %1941  ;;  %v463_v53 = vsub.f32 %v431_v35, %v447_v42  ;;  %v432_v57 = vmul.f32 0.03125, %v412_v21  ;;  %v582_v12 = vadd.f32 %v2513_v19, %v559_v13 }
 0x1c4   :  { %709 = vadd.xlane.f32.xlu1 %v708_v16  ;;  %v415_v58 = vpop.xlane.xlu0 %414  ;;  %v695_v1 = vunpack.c.l.bf16 %v684_v60  ;;  %v696_v17 = vunpack.c.h.bf16 %v684_v60  ;;  %v541_v22 = vmul.f32 %v1942_v5, %v493_v24  ;;  %v623_v42 = vunpack.c.l.bf16 %v612_v63 }
 0x1c5   :  { %v479_v61 = vmax.f32 %v463_v53, 0.0  ;;  %v464_v4 = vsub.f32 %v432_v57, %v448_v52  ;;  %v433_v8 = vmul.f32 0.03125, %v415_v58  ;;  %v1944_v28 = vpop.eup %1943  ;;  %v581_v35 = vadd.f32 %v2513_v19, %v558_v0 }
 0x1c6   :  { %637 = vadd.xlane.f32.xlu0 %v636_v45  ;;  %v418_v11 = vpop.xlane.xlu1 %417  ;;  %v723_v10 = vsel %vm289_vm12, %v695_v1, 0.0  ;;  %v726_v38 = vsel %vm289_vm12, %v696_v17, 0.0  ;;  %v624_v50 = vunpack.c.h.bf16 %v612_v63  ;;  %v542_v45 = vmul.f32 %v1944_v28, %v494_v48 }
 0x1c7   :  { %v511_v30 = vadd.f32 1e-05, %v479_v61  ;;  %v480_v3 = vmax.f32 %v464_v4, 0.0  ;;  %v465_v43 = vsub.f32 %v433_v8, %v449_v18  ;;  %v434_v31 = vmul.f32 0.03125, %v418_v11 }
 0x1c8   :  { %634 = vadd.xlane.f32.xlu1 %v633_v26  ;;  %v1946_v32 = vpop.eup %1945  ;;  %v595_v24 = vpack.c.bf16 %v582_v12, %v581_v35  ;;  %v564_v13 = vmul.f32 %v2497_v23, %v541_v22  ;;  %v651_v53 = vsel %vm289_vm12, %v623_v42, 0.0  ;;  %v565_v58 = vmul.f32 %v2497_v23, %v542_v45 }
 0x1c9   :  { %1949 = vrsqrt.f32 %v511_v30  ;;  %v512_v15 = vadd.f32 1e-05, %v480_v3  ;;  %v481_v16 = vmax.f32 %v465_v43, 0.0  ;;  %v466_v21 = vsub.f32 %v434_v31, %v450_v41  ;;  %v1948_v29 = vpop.eup %1947 }
 0x1ca   :  { %724 = vadd.xlane.f32.xlu0 %v723_v10  ;;  %v539_v52 = vmul.f32 %v1946_v32, %v491_v59  ;;  %v683_v57 = vmul.bf16 %v595_v24, %v595_v24  ;;  %v611_v41 = vmul.bf16 %v2527_v25, %v595_v24  ;;  %v540_v27 = vmul.f32 %v1948_v29, %v492_v47 }
 0x1cb   :  { %1951 = vrsqrt.f32 %v512_v15  ;;  %v513_v5 = vadd.f32 1e-05, %v481_v16  ;;  %v482_v18 = vmax.f32 %v466_v21, 0.0  ;;  %v654_v48 = vsel %vm289_vm12, %v624_v50, 0.0 }
 0x1cc   :  { %727 = vadd.xlane.f32.xlu1 %v726_v38  ;;  %v693_v60 = vunpack.c.l.bf16 %v683_v57  ;;  %v694_v63 = vunpack.c.h.bf16 %v683_v57  ;;  %v587_v37 = vadd.f32 %v2513_v19, %v564_v13  ;;  %v588_v36 = vadd.f32 %v2513_v19, %v565_v58 }
 0x1cd   :  { %1953 = vrsqrt.f32 %v513_v5  ;;  %v514_v33 = vadd.f32 1e-05, %v482_v18  ;;  %v562_v59 = vmul.f32 %v2497_v23, %v539_v52  ;;  %v1381_v0 = vunpack.c.l.b16 %v2523_v9 }
 0x1ce   :  { %652 = vadd.xlane.f32.xlu0 %v651_v53  ;;  %v717_v61 = vsel %vm289_vm12, %v693_v60, 0.0  ;;  %v622_v4 = vunpack.c.h.bf16 %v611_v41  ;;  %v2659_v62 = vpack.c.bf16 %v588_v36, %v587_v37  ;;  %v563_v39 = vmul.f32 %v2497_v23, %v540_v27 }
 0x1cf   :  { %1955 = vrsqrt.f32 %v514_v33  ;;  %v495_v47 = vsub.f32 %v2442_v54, %v2594_v20  ;;  %v720_v8 = vsel %vm289_vm12, %v694_v63, 0.0  ;;  %v621_v26 = vunpack.c.l.bf16 %v611_v41 }
 0x1d0   :  { %655 = vadd.xlane.f32.xlu1 %v654_v48  ;;  %v1382_v1 = vunpack.c.l.b16 %v595_v24  ;;  %v686_v9 = vmul.bf16 %v2659_v62, %v2659_v62  ;;  %v585_v17 = vadd.f32 %v2513_v19, %v562_v59  ;;  %v586_v12 = vadd.f32 %v2513_v19, %v563_v39 }
 0x1d1   :  { %v1388_v22 = vrot.slane %v1381_v0, 7  ;;  %v496_v28 = vsub.f32 %v2445_v55, %v2600_v6  ;;  %v648_v54 = vsel %vm289_vm12, %v622_v4, 0.0  ;;  %v1380_v3 = vunpack.c.l.b16 %v2556_v49 }
 0x1d2   :  { %718 = vadd.xlane.f32.xlu0 %v717_v61  ;;  %v699_v43 = vunpack.c.l.bf16 %v686_v9  ;;  %v700_v31 = vunpack.c.h.bf16 %v686_v9  ;;  %v597_v32 = vpack.c.bf16 %v586_v12, %v585_v17  ;;  %v497_v10 = vsub.f32 %v2429_v44, %v2591_v56 }
 0x1d3   :  { %v1950_v11 = vpop.eup %1949  ;;  %v645_v35 = vsel %vm289_vm12, %v621_v26, 0.0  ;;  %v498_v55 = vsub.f32 %v2436_v51, %v2598_v14  ;;  %v1383_v6 = vunpack.c.l.b16 %v2618_v46  ;;  %v1390_v16 = vrot.slane %v1382_v1, 6 }
 0x1d4   :  { %721 = vadd.xlane.f32.xlu1 %v720_v8  ;;  %v543_v30 = vmul.f32 %v1950_v11, %v495_v47  ;;  %v685_v49 = vmul.bf16 %v597_v32, %v597_v32  ;;  %v735_v29 = vsel %vm289_vm12, %v699_v43, 0.0  ;;  %v2683_v44 = vmul.bf16 %v2527_v25, %v597_v32 }
 0x1d5   :  { %v1952_v20 = vpop.eup %1951  ;;  %v738_v45 = vsel %vm289_vm12, %v700_v31, 0.0  ;;  %v1384_v14 = vunpack.c.l.b16 %v597_v32  ;;  %v1389_v52 = vsel %vm1263_vm5, %v1388_v22, %v1380_v3  ;;  %v1392_v33 = vrot.slane %v1383_v6, 5 }
 0x1d6   :  { %649 = vadd.xlane.f32.xlu0 %v648_v54  ;;  %v566_v38 = vmul.f32 %v2497_v23, %v543_v30  ;;  %v544_v42 = vmul.f32 %v1952_v20, %v496_v28  ;;  %v697_v51 = vunpack.c.l.bf16 %v685_v49  ;;  %v698_v13 = vunpack.c.h.bf16 %v685_v49 }
 0x1d7   :  { %v1954_v15 = vpop.eup %1953  ;;  %v625_v41 = vunpack.c.l.bf16 %v2683_v44  ;;  %v1391_v27 = vsel %vm1265_vm6, %v1390_v16, %v1389_v52  ;;  %v1385_v48 = vunpack.c.l.b16 %v2659_v62  ;;  %v1394_v60 = vrot.slane %v1384_v14, 4 }
 0x1d8   :  { %646 = vadd.xlane.f32.xlu1 %v645_v35  ;;  %v567_v21 = vmul.f32 %v2497_v23, %v544_v42  ;;  %v545_v56 = vmul.f32 %v1954_v15, %v497_v10  ;;  %v589_v24 = vadd.f32 %v2513_v19, %v566_v38  ;;  %v729_v57 = vsel %vm289_vm12, %v697_v51, 0.0 }
 0x1d9   :  { %v1956_v50 = vpop.eup %1955  ;;  %v732_v63 = vsel %vm289_vm12, %v698_v13, 0.0  ;;  %v1393_v0 = vsel %vm1267_vm7, %v1392_v33, %v1391_v27  ;;  %v657_v61 = vsel %vm289_vm12, %v625_v41, 0.0  ;;  %v1396_v8 = vrot.slane %v1385_v48, 3 }
 0x1da   :  { %736 = vadd.xlane.f32.xlu0 %v735_v29  ;;  %v590_v46 = vadd.f32 %v2513_v19, %v567_v21  ;;  %v546_v5 = vmul.f32 %v1956_v50, %v498_v55  ;;  %v568_v18 = vmul.f32 %v2497_v23, %v545_v56  ;;  %v1395_v4 = vsel %vm1269_vm8, %v1394_v60, %v1393_v0 }
 0x1db   :  { %v614_v28 = vmul.bf16 %v2527_v25, %v2659_v62  ;;  %v626_v38 = vunpack.c.h.bf16 %v2683_v44 }
 0x1dc   :  { %739 = vadd.xlane.f32.xlu1 %v738_v45  ;;  %v599_v53 = vpack.c.bf16 %v590_v46, %v589_v24  ;;  %v569_v58 = vmul.f32 %v2497_v23, %v546_v5  ;;  %v591_v37 = vadd.f32 %v2513_v19, %v568_v18  ;;  %v1922_v45 = vld [vmem:[%s2835_s12] sm:$0xff]  }
 0x1dd   :  { %v627_v31 = vunpack.c.l.bf16 %v614_v28  ;;  %v628_v42 = vunpack.c.h.bf16 %v614_v28  ;;  %v660_v35 = vsel %vm289_vm12, %v626_v38, 0.0 }
 0x1de   :  { %730 = vadd.xlane.f32.xlu0 %v729_v57  ;;  %v592_v36 = vadd.f32 %v2513_v19, %v569_v58  ;;  %v1386_v59 = vunpack.c.l.b16 %v599_v53  ;;  %v687_v47 = vmul.bf16 %v599_v53, %v599_v53  ;;  %v1397_v19 = vsel %vm1271_vm9, %v1396_v8, %v1395_v4 }
 0x1df   :  { %v663_v15 = vsel %vm289_vm12, %v627_v31, 0.0  ;;  %v615_v6 = vmul.bf16 %v2527_v25, %v599_v53  ;;  %v666_v16 = vsel %vm289_vm12, %v628_v42, 0.0 }
 0x1e0   :  { %733 = vadd.xlane.f32.xlu1 %v732_v63  ;;  %v600_v23 = vpack.c.bf16 %v592_v36, %v591_v37  ;;  %v1398_v39 = vrot.slane %v1386_v59, 2  ;;  %v702_v22 = vunpack.c.h.bf16 %v687_v47  ;;  %v701_v3 = vunpack.c.l.bf16 %v687_v47 }
 0x1e1   :  { %v630_v21 = vunpack.c.h.bf16 %v615_v6  ;;  %v629_v29 = vunpack.c.l.bf16 %v615_v6 }
 0x1e2   :  { %658 = vadd.xlane.f32.xlu0 %v657_v61  ;;  %v688_v26 = vmul.bf16 %v600_v23, %v600_v23  ;;  %v1387_v11 = vunpack.c.l.b16 %v600_v23  ;;  %v1399_v12 = vsel %vm1273_vm10, %v1398_v39, %v1397_v19  ;;  %v744_v32 = vsel %vm289_vm12, %v702_v22, 0.0 }
 0x1e3   :  { %v741_v10 = vsel %vm289_vm12, %v701_v3, 0.0  ;;  %v616_v62 = vmul.bf16 %v2527_v25, %v600_v23  ;;  %v672_v44 = vsel %vm289_vm12, %v630_v21, 0.0  ;;  %v669_v56 = vsel %vm289_vm12, %v629_v29, 0.0  ;;  %v1713_v25 = vld [vmem:[#allocation2] ss:$0 sm:$0xff] }
 0x1e4   :  { %v704_v1 = vunpack.c.h.bf16 %v688_v26  ;;  %v1400_v9 = vrot.slane %v1387_v11, 1  ;;  %v703_v17 = vunpack.c.l.bf16 %v688_v26 }
 0x1e5   :  { %v631_v55 = vunpack.c.l.bf16 %v616_v62  ;;  %v632_v50 = vunpack.c.h.bf16 %v616_v62 }
 0x1e6   :  { %v750_v30 = vsel %vm289_vm12, %v704_v1, 0.0  ;;  %v747_v54 = vsel %vm289_vm12, %v703_v17, 0.0  ;;  %v1401_v20 = vsel %vm1275_vm11, %v1400_v9, %v1399_v12 }
 0x1e7   :  { %751 = vadd.xlane.f32.xlu1 %v750_v30  ;;  %748 = vadd.xlane.f32.xlu0 %v747_v54  ;;  %v1402_v43 = vpack.c.b16 %v1401_v20, %v1401_v20  ;;  %v675_v49 = vsel %vm289_vm12, %v631_v55, 0.0  ;;  %v678_v24 = vsel %vm289_vm12, %v632_v50, 0.0 }
 0x1e9   :  { %1880 = vmatmul.mubr.msk.bf16.vlgmr.msra.gmra.mrb[4].mxu1 %vm289_vm12, %v1402_v43 }
 0x1ea   :  { %1885 = vmatprep.mubr.msk.bf16.mxu1 %vm2016_vm1, %v2015_v34  ;;  %1884 = vmatpush3.bf16.msra.mxu1 %v1922_v45 }
 0x1eb   :  { %745 = vadd.xlane.f32.xlu1 %v744_v32  ;;  %742 = vadd.xlane.f32.xlu0 %v741_v10 }
 0x1ec   :  { %1889 = vmatprep.subr.bf16.mxu1 %v2015_v34 }
 0x1ef   :  { %661 = vadd.xlane.f32.xlu1 %v660_v35  ;;  %664 = vadd.xlane.f32.xlu0 %v663_v15 }
 0x1f3   :  { %667 = vadd.xlane.f32.xlu1 %v666_v16  ;;  %676 = vadd.xlane.f32.xlu0 %v675_v49 }
 0x1f7   :  { %673 = vadd.xlane.f32.xlu1 %v672_v44  ;;  %670 = vadd.xlane.f32.xlu0 %v669_v56 }
 0x1fb   :  { %679 = vadd.xlane.f32.xlu1 %v678_v24 }
 0x20d   :  { %808 = vperm.xlu0 %1901, %v1713_v25  }
 0x243   :  { %v1335_v51 = vpop.xlane.xlu0 %1334 }
 0x244   :  { %v2745_v30 = vmul.f32 0.03125, %v1335_v51 }
 0x245   :  { %v1340_v14 = vpop.xlane.xlu1 %1339 }
 0x246   :  { %v1342_v38 = vmul.f32 %v2745_v30, %v2745_v30  ;;  %v1341_v62 = vmul.f32 0.03125, %v1340_v14 }
 0x247   :  { %v713_v46 = vpop.xlane.xlu0 %712 }
 0x248   :  { %v755_v23 = vmax.f32 %v713_v46, 1e-16  ;;  %v1343_v29 = vsub.f32 %v1341_v62, %v1342_v38 }
 0x249   :  { %v716_v13 = vpop.xlane.xlu1 %715 }
 0x24a   :  { %v756_v4 = vmax.f32 %v716_v13, 1e-16  ;;  %1957 = vrsqrt.f32 %v755_v23  ;;  %v1344_v51 = vmax.f32 %v1343_v29, 0.0 }
 0x24b   :  { %v2727_v5 = vpop.xlane.xlu0 %643 }
 0x24c   :  { %1959 = vrsqrt.f32 %v756_v4 }
 0x24d   :  { %v2729_v18 = vpop.xlane.xlu1 %640 }
 0x24f   :  { %v707_v52 = vpop.xlane.xlu0 %706 }
 0x250   :  { %v753_v39 = vmax.f32 %v707_v52, 1e-16 }
 0x251   :  { %v710_v53 = vpop.xlane.xlu1 %709 }
 0x252   :  { %v754_v26 = vmax.f32 %v710_v53, 1e-16  ;;  %1961 = vrsqrt.f32 %v753_v39 }
 0x253   :  { %v2731_v57 = vpop.xlane.xlu0 %637 }
 0x254   :  { %1963 = vrsqrt.f32 %v754_v26  ;;  %v1958_v10 = vpop.eup %1957 }
 0x255   :  { %v2733_v41 = vpop.xlane.xlu1 %634 }
 0x256   :  { %v1960_v55 = vpop.eup %1959 }
 0x257   :  { %v725_v58 = vpop.xlane.xlu0 %724 }
 0x258   :  { %v759_v11 = vmax.f32 %v725_v58, 1e-16  ;;  %v1346_v58 = vadd.f32 1e-05, %v1344_v51 }
 0x259   :  { %v728_v33 = vpop.xlane.xlu1 %727 }
 0x25a   :  { %v760_v1 = vmax.f32 %v728_v33, 1e-16  ;;  %1965 = vrsqrt.f32 %v759_v11 }
 0x25b   :  { %v2735_v27 = vpop.xlane.xlu0 %652 }
 0x25c   :  { %1967 = vrsqrt.f32 %v760_v1  ;;  %v1962_v16 = vpop.eup %1961 }
 0x25d   :  { %v2737_v48 = vpop.xlane.xlu1 %655 }
 0x25e   :  { %v1964_v49 = vpop.eup %1963 }
 0x25f   :  { %v719_v60 = vpop.xlane.xlu0 %718 }
 0x260   :  { %v757_v9 = vmax.f32 %v719_v60, 1e-16 }
 0x261   :  { %v722_v63 = vpop.xlane.xlu1 %721 }
 0x262   :  { %v758_v12 = vmax.f32 %v722_v63, 1e-16  ;;  %1969 = vrsqrt.f32 %v757_v9  ;;  %v788_v63 = vmul.f32 %v1960_v55, %v2727_v5 }
 0x263   :  { %v2739_v37 = vpop.xlane.xlu0 %649 }
 0x264   :  { %1971 = vrsqrt.f32 %v758_v12  ;;  %v1966_v21 = vpop.eup %1965 }
 0x265   :  { %v2741_v36 = vpop.xlane.xlu1 %646  ;;  %v791_v39 = vmul.f32 %v1966_v21, %v2735_v27 }
 0x266   :  { %v1968_v56 = vpop.eup %1967 }
 0x267   :  { %v737_v59 = vpop.xlane.xlu0 %736 }
 0x268   :  { %v763_v22 = vmax.f32 %v737_v59, 1e-16  ;;  %v787_v59 = vmul.f32 %v1958_v10, %v2729_v18 }
 0x269   :  { %v740_v0 = vpop.xlane.xlu1 %739 }
 0x26a   :  { %v764_v28 = vmax.f32 %v740_v0, 1e-16  ;;  %1973 = vrsqrt.f32 %v763_v22  ;;  %v786_v0 = vmul.f32 %v1964_v49, %v2731_v57 }
 0x26b   :  { %v731_v61 = vpop.xlane.xlu0 %730 }
 0x26c   :  { %v761_v54 = vmax.f32 %v731_v61, 1e-16  ;;  %1975 = vrsqrt.f32 %v764_v28  ;;  %v1970_v50 = vpop.eup %1969  ;;  %v785_v61 = vmul.f32 %v1962_v16, %v2733_v41 }
 0x26d   :  { %v734_v47 = vpop.xlane.xlu1 %733  ;;  %v789_v11 = vmul.f32 %v1970_v50, %v2741_v36 }
 0x26e   :  { %1977 = vrsqrt.f32 %v761_v54  ;;  %v762_v42 = vmax.f32 %v734_v47, 1e-16  ;;  %v1972_v25 = vpop.eup %1971  ;;  %v792_v47 = vmul.f32 %v1968_v56, %v2737_v48 }
 0x26f   :  { %v2743_v8 = vpop.xlane.xlu0 %658  ;;  %v790_v26 = vmul.f32 %v1972_v25, %v2739_v37 }
 0x274   :  { %v752_v17 = vpop.xlane.xlu1 %751  ;;  %v749_v19 = vpop.xlane.xlu0 %748 }
 0x275   :  { %v767_v43 = vmax.f32 %v749_v19, 1e-16  ;;  %v768_v6 = vmax.f32 %v752_v17, 1e-16  ;;  %v1974_v45 = vpop.eup %1973 }
 0x276   :  { %v1976_v46 = vpop.eup %1975 }
 0x277   :  { %1979 = vrsqrt.f32 %v767_v43 }
 0x278   :  { %v746_v20 = vpop.xlane.xlu1 %745  ;;  %v743_v3 = vpop.xlane.xlu0 %742 }
 0x279   :  { %v766_v31 = vmax.f32 %v746_v20, 1e-16  ;;  %v765_v32 = vmax.f32 %v743_v3, 1e-16  ;;  %v1978_v13 = vpop.eup %1977 }
 0x27a   :  { %v793_v9 = vmul.f32 %v1978_v13, %v2743_v8 }
 0x27b   :  { %1981 = vrsqrt.f32 %v766_v31 }
 0x27c   :  { %v662_v35 = vpop.xlane.xlu1 %661  ;;  %v665_v15 = vpop.xlane.xlu0 %664  ;;  %1983 = vrsqrt.f32 %v765_v32 }
 0x27d   :  { %1985 = vrsqrt.f32 %v762_v42  ;;  %v795_v17 = vmul.f32 %v1974_v45, %v665_v15 }
 0x27e   :  { %1987 = vrsqrt.f32 %v768_v6 }
 0x27f   :  { %1989 = vrsqrt.f32 %v1346_v58 }
 0x280   :  { %v668_v44 = vpop.xlane.xlu1 %667  ;;  %v677_v24 = vpop.xlane.xlu0 %676 }
 0x281   :  { %v1980_v52 = vpop.eup %1979  ;;  %v796_v18 = vmul.f32 %v1976_v46, %v668_v44 }
 0x282   :  { %v799_v19 = vmul.f32 %v1980_v52, %v677_v24 }
 0x284   :  { %v674_v14 = vpop.xlane.xlu1 %673  ;;  %v671_v33 = vpop.xlane.xlu0 %670 }
 0x285   :  { %v1982_v53 = vpop.eup %1981 }
 0x286   :  { %v1984_v60 = vpop.eup %1983  ;;  %v798_v57 = vmul.f32 %v1982_v53, %v674_v14 }
 0x287   :  { %v1986_v4 = vpop.eup %1985  ;;  %v797_v12 = vmul.f32 %v1984_v60, %v671_v33 }
 0x288   :  { %v680_v23 = vpop.xlane.xlu1 %679  ;;  %v1988_v1 = vpop.eup %1987  ;;  %v794_v5 = vmul.f32 %v1986_v4, %v662_v35 }
 0x289   :  { %v800_v41 = vmul.f32 %v1988_v1, %v680_v23 }
 0x28c   :  { %v809_v22 = vpop.permute.xlu0 %808 }
 0x28d   :  { %v811_v28 = vmul.f32 %v809_v22, %v785_v61  ;;  %v812_v54 = vmul.f32 %v809_v22, %v786_v0  ;;  %v813_v27 = vmul.f32 %v809_v22, %v787_v59  ;;  %v814_v20 = vmul.f32 %v809_v22, %v788_v63 }
 0x28e   :  { %v815_v48 = vmul.f32 %v809_v22, %v789_v11  ;;  %v816_v3 = vmul.f32 %v809_v22, %v790_v26  ;;  %v817_v37 = vmul.f32 %v809_v22, %v791_v39  ;;  %v818_v43 = vmul.f32 %v809_v22, %v792_v47 }
 0x28f   :  { %v819_v36 = vmul.f32 %v809_v22, %v793_v9  ;;  %v820_v31 = vmul.f32 %v809_v22, %v794_v5  ;;  %v821_v32 = vmul.f32 %v809_v22, %v795_v17  ;;  %v822_v8 = vmul.f32 %v809_v22, %v796_v18 }
 0x290   :  { %v823_v10 = vmul.f32 %v809_v22, %v797_v12  ;;  %v824_v38 = vmul.f32 %v809_v22, %v798_v57  ;;  %v825_v62 = vmul.f32 %v809_v22, %v799_v19  ;;  %v826_v42 = vmul.f32 %v809_v22, %v800_v41  ;;  %v1990_v57 = vpop.eup %1989 }
 0x291   :  { %v827_v35 = vpack.c.bf16 %v812_v54, %v811_v28  ;;  %v828_v15 = vpack.c.bf16 %v814_v20, %v813_v27  ;;  %v829_v55 = vpack.c.bf16 %v816_v3, %v815_v48  ;;  %v830_v6 = vpack.c.bf16 %v818_v43, %v817_v37 }
 0x292   :  { %v831_v16 = vpack.c.bf16 %v820_v31, %v819_v36  ;;  %v832_v49 = vpack.c.bf16 %v822_v8, %v821_v32  ;;  %v833_v21 = vpack.c.bf16 %v824_v38, %v823_v10  ;;  %v834_v24 = vpack.c.bf16 %v826_v42, %v825_v62  ;;  %v1923_v10 = vld [vmem:[%s2837_s14] sm:$0xff]  }
 0x293   :  { %v1466_v29 = vunpack.c.l.b16 %v827_v35  ;;  %v1467_v44 = vunpack.c.h.b16 %v827_v35  ;;  %v1468_v56 = vunpack.c.l.b16 %v828_v15  ;;  %v1469_v50 = vunpack.c.h.b16 %v828_v15  ;;  %v1719_v42 = vld [vmem:[%s2834_s11] ss:$0 sm:$0xff]  ;;  %v1924_v35 = vld [vmem:[%s2837_s14 + $0x8] sm:$0xff]  }
 0x294   :  { %v1470_v25 = vunpack.c.l.b16 %v829_v55  ;;  %v1471_v45 = vunpack.c.h.b16 %v829_v55  ;;  %v1472_v51 = vunpack.c.l.b16 %v830_v6  ;;  %v1473_v14 = vunpack.c.h.b16 %v830_v6 }
 0x295   :  { %v1474_v46 = vunpack.c.l.b16 %v831_v16  ;;  %v1475_v13 = vunpack.c.h.b16 %v831_v16  ;;  %v1476_v52 = vunpack.c.l.b16 %v832_v49  ;;  %v1477_v53 = vunpack.c.h.b16 %v832_v49 }
 0x296   :  { %v1478_v33 = vunpack.c.l.b16 %v833_v21  ;;  %v1479_v60 = vunpack.c.h.b16 %v833_v21  ;;  %v1485_v58 = vrot.slane %v1466_v29, %v2249_v2  ;;  %v1489_v63 = vrot.slane %v1467_v44, %v2252_v7 }
 0x297   :  { %v1494_v59 = vrot.slane %v1468_v56, %v2249_v2  ;;  %v1498_v0 = vrot.slane %v1469_v50, %v2252_v7  ;;  %v1480_v61 = vunpack.c.l.b16 %v834_v24  ;;  %v1481_v23 = vunpack.c.h.b16 %v834_v24 }
 0x298   :  { %v1503_v4 = vrot.slane %v1470_v25, %v2249_v2  ;;  %v1507_v39 = vrot.slane %v1471_v45, %v2252_v7  ;;  %v1490_v47 = vsel %vm1114_vm2, %v1489_v63, %v1485_v58  ;;  %v1512_v11 = vrot.slane %v1472_v51, %v2249_v2  ;;  %v1728_v45 = vld [vmem:[%s2838_s15] ss:$0 sm:$0xff] }
 0x299   :  { %v1499_v26 = vsel %vm1114_vm2, %v1498_v0, %v1494_v59  ;;  %v1516_v1 = vrot.slane %v1473_v14, %v2252_v7  ;;  %v1521_v5 = vrot.slane %v1474_v46, %v2249_v2  ;;  %v1525_v17 = vrot.slane %v1475_v13, %v2252_v7 }
 0x29a   :  { %v1508_v9 = vsel %vm1114_vm2, %v1507_v39, %v1503_v4  ;;  %v1530_v18 = vrot.slane %v1476_v52, %v2249_v2  ;;  %v1534_v19 = vrot.slane %v1477_v53, %v2252_v7  ;;  %v1345_v12 = vsub.f32 %v2552_v40, %v2745_v30 }
 0x29b   :  { %v1539_v41 = vrot.slane %v1478_v33, %v2249_v2  ;;  %v1543_v22 = vrot.slane %v1479_v60, %v2252_v7  ;;  %v1554_v28 = vsel %vm1263_vm5, %v1499_v26, %v1490_v47  ;;  %v1517_v54 = vsel %vm1114_vm2, %v1516_v1, %v1512_v11 }
 0x29c   :  { %v1548_v27 = vrot.slane %v1480_v61, %v2249_v2  ;;  %v1552_v20 = vrot.slane %v1481_v23, %v2252_v7  ;;  %v1555_v48 = vsel %vm1265_vm6, %v1508_v9, %v1554_v28  ;;  %v1526_v3 = vsel %vm1114_vm2, %v1525_v17, %v1521_v5  ;;  %v1718_v2 = vld [vmem:[%s2833_s10] ss:$0 sm:$0xff] }
 0x29d   :  { %v1556_v37 = vsel %vm1267_vm7, %v1517_v54, %v1555_v48  ;;  %v1348_v43 = vmul.f32 %v1990_v57, %v1345_v12  ;;  %v1535_v40 = vsel %vm1114_vm2, %v1534_v19, %v1530_v18  ;;  %v1544_v36 = vsel %vm1114_vm2, %v1543_v22, %v1539_v41 }
 0x29e   :  { %v1557_v30 = vsel %vm1269_vm8, %v1526_v3, %v1556_v37  ;;  %v1553_v7 = vsel %vm1114_vm2, %v1552_v20, %v1548_v27 }
 0x29f   :  { %v1558_v31 = vsel %vm1271_vm9, %v1535_v40, %v1557_v30  ;;  %v1356_v62 = vmul.f32 %v1718_v2, %v1348_v43 }
 0x2a0   :  { %v1559_v32 = vsel %vm1273_vm10, %v1544_v36, %v1558_v31 }
 0x2a1   :  { %v1560_v8 = vsel %vm1275_vm11, %v1553_v7, %v1559_v32  ;;  %v1364_v15 = vadd.f32 %v1719_v42, %v1356_v62 }
 0x2a2   :  { %v1561_v38 = vpack.c.b16 %v1560_v8, %v1560_v8 }
 0x2a3   :  { %v1365_v55 = vpack.c.bf16 %v1364_v15, %v1364_v15 }
 0x2a4   :  { %1886 = vmatmul.mubr.msk.bf16.vlgmr.msra.gmra.mrb[8].mxu1 %vm899_vm0, %v1561_v38 }
 0x2a5   :  { %1890 = vmatpush3.bf16.msra.mxu1 %v1923_v10  ;;  %1893 = vmatprep.mubr.msk.bf16.mxu1 %vm2016_vm1, %v2015_v34 }
 0x2a6   :  { %1891 = vmatprep.subr.bf16.mxu1 %v2015_v34 }
 0x2a9   :  { %1892 = vmatpush3.bf16.msra.mxu1 %v1924_v35 }
 0x2ac   :  { %1894 = vmatmul.mubr.msk.bf16.vlgmr.msra.gmra.mrb[12].mxu1 %vm289_vm12, %v1365_v55 }
 0x2bc   :  { %v1452_v6 = vpop.f32.mrb[4].mxu1 }
 0x2bd   :  { %v1881_v16 = vpop.f32.mrb[5].mxu1 }
 0x2be   :  { %v1455_v49 = vpop.f32.mrb[6].mxu1 }
 0x2bf   :  { %v1882_v21 = vpop.f32.mrb[7].mxu1 }
 0x377   :  { %v1605_v29 = vpop.f32.mrb[8].mxu1 }
 0x378   :  { %v1606_v44 = vadd.f32 %v1605_v29, %v1452_v6  ;;  %v1887_v56 = vpop.f32.mrb[9].mxu1 }
 0x379   :  { %v1608_v50 = vpop.f32.mrb[10].mxu1 }
 0x37a   :  { %v1888_v24 = vpop.f32.mrb[11].mxu1 }
 0x37f   :  { %v1664_v25 = vpop.f32.mrb[12].mxu1 }
 0x380   :  { %v1670_v34 = vadd.f32 %v1664_v25, %v1606_v44  ;;  %v1895_v51 = vpop.f32.mrb[13].mxu1 }
 0x381   :  { %v1667_v14 = vpop.f32.mrb[14].mxu1 }
 0x382   :  { %v1896_v46 = vpop.f32.mrb[15].mxu1  ;;  %v1678_v13 = vadd.f32 %v1728_v45, %v1670_v34 }
 0x384   :  { %1679 = vst [vmem:[#allocation3] sm:$0xff] %v1678_v13 }
 0x385   :  { %2002 = shalt.err (!%p1999_p4)
}
 0x386   :  { %s2003_s15 = scalar_lea.hbm %s2839_s16, 128 }
 0x387   :  { %p2004_p5 = scmp.ne.s32.totalorder %s2839_s16, %s2003_s15  ;;  %p2007_p6 = scmp.lt.u32.totalorder %s2003_s15, %s2839_s16 }
 0x389   :  { %p2009_p7 = pnand %p2007_p6, %p2004_p5 }
 0x38b   :  { %2012 = shalt.err (!%p2009_p7)
}
 0x38c   :  { %1689 = dma.vmem_to_hbm [thread:$0]  %s1687_s1, 128, %s2839_s16, [#allocation4]  }
 0x38d   :  { %2013 = dma.done.wait [#allocation4], 128  }
 0x38e   :  { %2014 = vsyncadd [#allocation4], 4294967168 }
 0x38f   :  { %1693 = vsyncpa [#allocation4], 1 }

</bundles_post_ra>
